<compile_context>
chip_gen: v7x
topology: tpu7x:2x2x1
jax: 0.10.0
libtpu: 0.0.40
codegen_flags: <defaults>
</compile_context>

<pallas_src>
import jax
import jax.numpy as jnp
from jax import lax
from jax.experimental import pallas as pl
from jax.experimental.pallas import tpu as pltpu

DKM_ITERS = 10      # fixed number of soft k-means refinement steps
DKM_TEMP = 1.0      # softmax temperature on negative euclidean distance
NUM_CLUSTERS = 2    # binary clustering
DEN_EPS = 1e-6      # guards the centroid update against zero assignment mass


def _fused_kernel(x_ref, w_ref, b_ref, score_ref, c_ref, at_ref):
    N, D = x_ref.shape
    K = NUM_CLUSTERS
    inv_temp = 1.0 / DKM_TEMP

    X = x_ref[...]                                             # (N, D) f32

    # ---- pred_score = sigmoid(fc1(X)), lane-dense (1, N) row -------------------
    logits = lax.dot_general(w_ref[...], X, (((1,), (1,)), ((), ())),
                             preferred_element_type=jnp.float32)   # (1, N)
    score_ref[...] = jax.nn.sigmoid(logits + b_ref[0])

    # ---- DKM loop-invariant precompute -----------------------------------------
    # lane-dense ||x_n||^2 row: (1, D) @ (N, D)^T via MXU -> (1, N)
    x2_row = lax.dot_general(jnp.ones((1, D), jnp.float32), X * X,
                             (((1,), (1,)), ((), ())),
                             preferred_element_type=jnp.float32)   # (1, N)
    # X_aug rows: [x_n | 1]  =>  a0 @ X_aug fuses numerator + assignment mass.
    X_aug = jnp.concatenate([X, jnp.ones((N, 1), jnp.float32)], axis=1)  # (N, D+1)
    # column sums of X_aug = [sum_n x_n | N]; lets num1 = S - num0 per iteration.
    S = jnp.dot(jnp.ones((1, N), jnp.float32), X_aug,
                preferred_element_type=jnp.float32)                # (1, D+1)

    def assign(C):
        # soft assignment to cluster 0, transposed lane-dense layout
        c2 = jnp.sum(C * C, axis=1, keepdims=True)                 # (K, 1)
        m = lax.dot_general(C, X, (((1,), (1,)), ((), ())),
                            preferred_element_type=jnp.float32)    # (K, N)
        d = jnp.sqrt(jnp.maximum(x2_row + c2 - 2.0 * m, 0.0))      # (K, N) euclid dist
        # exact K=2 softmax over clusters: softmax(-d/T)[0] = sigmoid((d1 - d0)/T)
        return jax.nn.sigmoid((d[1:2, :] - d[0:1, :]) * inv_temp)  # (1, N)

    def body(_, C):
        a0 = assign(C)
        num0 = jnp.dot(a0, X_aug, preferred_element_type=jnp.float32)  # (1, D+1)
        num1 = S - num0                                                # (1, D+1)
        num = jnp.concatenate([num0, num1], axis=0)                    # (K, D+1)
        inv_den = pl.reciprocal(num[:, D:] + DEN_EPS, approx=True)     # (K, 1)
        return num[:, :D] * inv_den                                    # (K, D)

    # init_c: first K rows of the embedding matrix.
    # TODO(synk): module uses random.sample / kmeans++ init; fixed to rows [0, 1] here.
    C = lax.fori_loop(0, DKM_ITERS, body, X[:K, :], unroll=True)
    c_ref[...] = C

    # ---- final soft assignment, emitted lane-dense as (K, N) --------------------
    a0 = assign(C)
    at_ref[...] = jnp.concatenate([a0, 1.0 - a0], axis=0)             # (K, N)


def mono_sbert_binary_qsc_forward(output_emb, fc1_w, fc1_b):
    """output_emb: (N, D) f32 sentence embeddings; fc1_w: (1, D); fc1_b: (1,)."""
    N, D = output_emb.shape
    K = NUM_CLUSTERS

    cost = pl.CostEstimate(
        flops=(2 * N * D                                   # fc1
               + 2 * N * D + 2 * N * (D + 1)               # x2_row + S precompute
               + DKM_ITERS * (2 * K * N * D + 2 * N * (D + 1))  # per-iter dist + update matmuls
               + 2 * K * N * D),                           # final assignment
        transcendentals=(DKM_ITERS + 1) * (K * N + N) + DKM_ITERS * K,  # sqrt/sigmoid/recip
        bytes_accessed=4 * (N * D + D + 1                  # inputs
                            + N + K * D + K * N),          # outputs
    )

    # NOTE: gridless, X-resident design (~2x N*D*4 B in VMEM). Fine at these shapes;
    # at production SBERT N/D set pltpu.CompilerParams(vmem_limit_bytes=...) or tile N.
    scores_1n, C, aT = pl.pallas_call(
        _fused_kernel,
        out_shape=(
            jax.ShapeDtypeStruct((1, N), jnp.float32),    # pred_score (lane-dense row)
            jax.ShapeDtypeStruct((K, D), jnp.float32),    # centroids C
            jax.ShapeDtypeStruct((K, N), jnp.float32),    # soft assignments, transposed
        ),
        in_specs=[
            pl.BlockSpec(memory_space=pltpu.MemorySpace.VMEM),   # output_emb
            pl.BlockSpec(memory_space=pltpu.MemorySpace.VMEM),   # fc1_w
            pl.BlockSpec(memory_space=pltpu.MemorySpace.SMEM),   # fc1_b (scalar)
        ],
        out_specs=(
            pl.BlockSpec(memory_space=pltpu.MemorySpace.VMEM),
            pl.BlockSpec(memory_space=pltpu.MemorySpace.VMEM),
            pl.BlockSpec(memory_space=pltpu.MemorySpace.VMEM),
        ),
        cost_estimate=cost,
    )(output_emb, fc1_w, fc1_b)

    pred_score = scores_1n.reshape(-1)   # .flatten()
    a = aT.T                             # (N, K) layout of the module's `a`
    return pred_score, C, a


if __name__ == "__main__":
    key = jax.random.PRNGKey(0)
    N, D = 8, 32  # 8 (query, paragraph) pairs, 32-dim synthetic SBERT embedding

    k_emb, k_w = jax.random.split(key)
    # deterministic "sentence embeddings" standing in for the SBERT encoder output
    output_emb = jax.random.normal(k_emb, (N, D), dtype=jnp.float32)
    # fc1 parameters (Linear(D, 1)), deterministic init
    fc1_w = 0.1 * jax.random.normal(k_w, (1, D), dtype=jnp.float32)
    fc1_b = jnp.zeros((1,), dtype=jnp.float32)

    fwd = jax.jit(mono_sbert_binary_qsc_forward)
    pred_score, C, a = fwd(output_emb, fc1_w, fc1_b)
    jax.block_until_ready((pred_score, C, a))

    assert pred_score.shape == (N,)
    assert C.shape == (NUM_CLUSTERS, D)
    assert a.shape == (N, NUM_CLUSTERS)
    assert bool(jnp.all(jnp.isfinite(pred_score)))
    assert bool(jnp.all(jnp.isfinite(C)))
    assert bool(jnp.all(jnp.isfinite(a)))
    assert bool(jnp.all((a >= 0.0) & (a <= 1.0)))
    assert bool(jnp.allclose(jnp.sum(a, axis=1), 1.0, atol=1e-5))
    print("KERNEL_OK")
</pallas_src>

<mosaic_0001>
module attributes {stable_mosaic.version = 11 : i64} {
  func.func @_fused_kernel(%arg0: memref<8x32xf32, #tpu.memory_space<vmem>>, %arg1: memref<1x32xf32, #tpu.memory_space<vmem>>, %arg2: memref<1xf32, #tpu.memory_space<smem>>, %arg3: memref<1x8xf32, #tpu.memory_space<vmem>>, %arg4: memref<2x32xf32, #tpu.memory_space<vmem>>, %arg5: memref<2x8xf32, #tpu.memory_space<vmem>>) attributes {dimension_semantics = [], scalar_prefetch = 0 : i64, scratch_operands = 0 : i64, tpu.core_type = #tpu.core_type<tc>} {
    %c0 = arith.constant 0 : index
    %c0_0 = arith.constant 0 : index
    %0 = vector.load %arg0[%c0, %c0_0] : memref<8x32xf32, #tpu.memory_space<vmem>>, vector<8x32xf32>
    %c0_1 = arith.constant 0 : index
    %c0_2 = arith.constant 0 : index
    %1 = vector.load %arg1[%c0_1, %c0_2] : memref<1x32xf32, #tpu.memory_space<vmem>>, vector<1x32xf32>
    %cst = arith.constant dense<0.000000e+00> : vector<1x8xf32>
    %2 = tpu.matmul %1, %0, %cst {dimension_numbers = #tpu.dot_dimension_numbers<[1], [1], [0], [0], [0, 0, 1, 0], [], []>} : vector<1x32xf32>, vector<8x32xf32>, vector<1x8xf32> -> vector<1x8xf32>
    %c0_3 = arith.constant 0 : index
    %3 = memref.load %arg2[%c0_3] : memref<1xf32, #tpu.memory_space<smem>>
    %4 = vector.broadcast %3 : f32 to vector<1x8xf32>
    %5 = arith.addf %2, %4 : vector<1x8xf32>
    %6 = arith.negf %5 : vector<1x8xf32>
    %7 = math.exp %6 : vector<1x8xf32>
    %cst_4 = arith.constant 1.000000e+00 : f32
    %8 = vector.broadcast %cst_4 : f32 to vector<1x8xf32>
    %9 = arith.addf %8, %7 : vector<1x8xf32>
    %10 = arith.divf %8, %9 : vector<1x8xf32>
    %c0_5 = arith.constant 0 : index
    %c0_6 = arith.constant 0 : index
    %11 = vector.load %arg3[%c0_5, %c0_6] : memref<1x8xf32, #tpu.memory_space<vmem>>, vector<1x8xf32>
    tpu.vector_store %arg3[%c0_5, %c0_6], %10 {strides = array<i32>} : memref<1x8xf32, #tpu.memory_space<vmem>>, vector<1x8xf32>,
    %cst_7 = arith.constant 1.000000e+00 : f32
    %12 = vector.broadcast %cst_7 : f32 to vector<1x32xf32>
    %13 = arith.mulf %0, %0 : vector<8x32xf32>
    %cst_8 = arith.constant dense<0.000000e+00> : vector<1x8xf32>
    %14 = tpu.matmul %12, %13, %cst_8 {dimension_numbers = #tpu.dot_dimension_numbers<[1], [1], [0], [0], [0, 0, 1, 0], [], []>} : vector<1x32xf32>, vector<8x32xf32>, vector<1x8xf32> -> vector<1x8xf32>
    %cst_9 = arith.constant 1.000000e+00 : f32
    %15 = vector.broadcast %cst_9 : f32 to vector<8x1xf32>
    %16 = tpu.concatenate %0, %15 in 1 : vector<8x32xf32>, vector<8x1xf32> -> vector<8x33xf32>
    %cst_10 = arith.constant 1.000000e+00 : f32
    %17 = vector.broadcast %cst_10 : f32 to vector<1x8xf32>
    %cst_11 = arith.constant dense<0.000000e+00> : vector<1x33xf32>
    %18 = tpu.matmul %17, %16, %cst_11 {dimension_numbers = #tpu.dot_dimension_numbers<[1], [0], [0], [1], [0, 0, 1, 1], [], []>} : vector<1x8xf32>, vector<8x33xf32>, vector<1x33xf32> -> vector<1x33xf32>
    %19 = vector.extract_strided_slice %0 {offsets = [0, 0], sizes = [2, 32], strides = [1, 1]} : vector<8x32xf32> to vector<2x32xf32>
    %c0_i32 = arith.constant 0 : i32
    %20 = arith.mulf %19, %19 : vector<2x32xf32>
    %cst_12 = arith.constant dense<0.000000e+00> : vector<2xf32>
    %21 = vector.multi_reduction <add>, %20, %cst_12 [1] : vector<2x32xf32> to vector<2xf32>
    %22 = vector.shape_cast %21 : vector<2xf32> to vector<2x1xf32>
    %cst_13 = arith.constant dense<0.000000e+00> : vector<2x8xf32>
    %23 = tpu.matmul %19, %0, %cst_13 {dimension_numbers = #tpu.dot_dimension_numbers<[1], [1], [0], [0], [0, 0, 1, 0], [], []>} : vector<2x32xf32>, vector<8x32xf32>, vector<2x8xf32> -> vector<2x8xf32>
    %24 = vector.broadcast %14 : vector<1x8xf32> to vector<2x8xf32>
    %25 = vector.broadcast %22 : vector<2x1xf32> to vector<2x8xf32>
    %26 = arith.addf %24, %25 : vector<2x8xf32>
    %cst_14 = arith.constant 2.000000e+00 : f32
    %27 = vector.broadcast %cst_14 : f32 to vector<2x8xf32>
    %28 = arith.mulf %27, %23 : vector<2x8xf32>
    %29 = arith.subf %26, %28 : vector<2x8xf32>
    %cst_15 = arith.constant 0.000000e+00 : f32
    %30 = vector.broadcast %cst_15 : f32 to vector<2x8xf32>
    %31 = arith.maximumf %29, %30 : vector<2x8xf32>
    %32 = math.sqrt %31 : vector<2x8xf32>
    %33 = vector.extract_strided_slice %32 {offsets = [1, 0], sizes = [1, 8], strides = [1, 1]} : vector<2x8xf32> to vector<1x8xf32>
    %34 = vector.extract_strided_slice %32 {offsets = [0, 0], sizes = [1, 8], strides = [1, 1]} : vector<2x8xf32> to vector<1x8xf32>
    %35 = arith.subf %33, %34 : vector<1x8xf32>
    %cst_16 = arith.constant 1.000000e+00 : f32
    %36 = vector.broadcast %cst_16 : f32 to vector<1x8xf32>
    %37 = arith.mulf %35, %36 : vector<1x8xf32>
    %38 = arith.negf %37 : vector<1x8xf32>
    %39 = math.exp %38 : vector<1x8xf32>
    %cst_17 = arith.constant 1.000000e+00 : f32
    %40 = vector.broadcast %cst_17 : f32 to vector<1x8xf32>
    %41 = arith.addf %40, %39 : vector<1x8xf32>
    %42 = arith.divf %40, %41 : vector<1x8xf32>
    %cst_18 = arith.constant dense<0.000000e+00> : vector<1x33xf32>
    %43 = tpu.matmul %42, %16, %cst_18 {dimension_numbers = #tpu.dot_dimension_numbers<[1], [0], [0], [1], [0, 0, 1, 1], [], []>} : vector<1x8xf32>, vector<8x33xf32>, vector<1x33xf32> -> vector<1x33xf32>
    %44 = arith.subf %18, %43 : vector<1x33xf32>
    %45 = tpu.concatenate %43, %44 in 0 : vector<1x33xf32>, vector<1x33xf32> -> vector<2x33xf32>
    %46 = vector.extract_strided_slice %45 {offsets = [0, 32], sizes = [2, 1], strides = [1, 1]} : vector<2x33xf32> to vector<2x1xf32>
    %cst_19 = arith.constant 9.99999997E-7 : f32
    %47 = vector.broadcast %cst_19 : f32 to vector<2x1xf32>
    %48 = arith.addf %46, %47 : vector<2x1xf32>
    %49 = tpu.reciprocal %48 {approx = true} : vector<2x1xf32> -> vector<2x1xf32>
    %50 = vector.extract_strided_slice %45 {offsets = [0, 0], sizes = [2, 32], strides = [1, 1]} : vector<2x33xf32> to vector<2x32xf32>
    %51 = vector.broadcast %49 : vector<2x1xf32> to vector<2x32xf32>
    %52 = arith.mulf %50, %51 : vector<2x32xf32>
    %c1_i32 = arith.constant 1 : i32
    %53 = arith.mulf %52, %52 : vector<2x32xf32>
    %cst_20 = arith.constant dense<0.000000e+00> : vector<2xf32>
    %54 = vector.multi_reduction <add>, %53, %cst_20 [1] : vector<2x32xf32> to vector<2xf32>
    %55 = vector.shape_cast %54 : vector<2xf32> to vector<2x1xf32>
    %cst_21 = arith.constant dense<0.000000e+00> : vector<2x8xf32>
    %56 = tpu.matmul %52, %0, %cst_21 {dimension_numbers = #tpu.dot_dimension_numbers<[1], [1], [0], [0], [0, 0, 1, 0], [], []>} : vector<2x32xf32>, vector<8x32xf32>, vector<2x8xf32> -> vector<2x8xf32>
    %57 = vector.broadcast %14 : vector<1x8xf32> to vector<2x8xf32>
    %58 = vector.broadcast %55 : vector<2x1xf32> to vector<2x8xf32>
    %59 = arith.addf %57, %58 : vector<2x8xf32>
    %cst_22 = arith.constant 2.000000e+00 : f32
    %60 = vector.broadcast %cst_22 : f32 to vector<2x8xf32>
    %61 = arith.mulf %60, %56 : vector<2x8xf32>
    %62 = arith.subf %59, %61 : vector<2x8xf32>
    %cst_23 = arith.constant 0.000000e+00 : f32
    %63 = vector.broadcast %cst_23 : f32 to vector<2x8xf32>
    %64 = arith.maximumf %62, %63 : vector<2x8xf32>
    %65 = math.sqrt %64 : vector<2x8xf32>
    %66 = vector.extract_strided_slice %65 {offsets = [1, 0], sizes = [1, 8], strides = [1, 1]} : vector<2x8xf32> to vector<1x8xf32>
    %67 = vector.extract_strided_slice %65 {offsets = [0, 0], sizes = [1, 8], strides = [1, 1]} : vector<2x8xf32> to vector<1x8xf32>
    %68 = arith.subf %66, %67 : vector<1x8xf32>
    %cst_24 = arith.constant 1.000000e+00 : f32
    %69 = vector.broadcast %cst_24 : f32 to vector<1x8xf32>
    %70 = arith.mulf %68, %69 : vector<1x8xf32>
    %71 = arith.negf %70 : vector<1x8xf32>
    %72 = math.exp %71 : vector<1x8xf32>
    %cst_25 = arith.constant 1.000000e+00 : f32
    %73 = vector.broadcast %cst_25 : f32 to vector<1x8xf32>
    %74 = arith.addf %73, %72 : vector<1x8xf32>
    %75 = arith.divf %73, %74 : vector<1x8xf32>
    %cst_26 = arith.constant dense<0.000000e+00> : vector<1x33xf32>
    %76 = tpu.matmul %75, %16, %cst_26 {dimension_numbers = #tpu.dot_dimension_numbers<[1], [0], [0], [1], [0, 0, 1, 1], [], []>} : vector<1x8xf32>, vector<8x33xf32>, vector<1x33xf32> -> vector<1x33xf32>
    %77 = arith.subf %18, %76 : vector<1x33xf32>
    %78 = tpu.concatenate %76, %77 in 0 : vector<1x33xf32>, vector<1x33xf32> -> vector<2x33xf32>
    %79 = vector.extract_strided_slice %78 {offsets = [0, 32], sizes = [2, 1], strides = [1, 1]} : vector<2x33xf32> to vector<2x1xf32>
    %cst_27 = arith.constant 9.99999997E-7 : f32
    %80 = vector.broadcast %cst_27 : f32 to vector<2x1xf32>
    %81 = arith.addf %79, %80 : vector<2x1xf32>
    %82 = tpu.reciprocal %81 {approx = true} : vector<2x1xf32> -> vector<2x1xf32>
    %83 = vector.extract_strided_slice %78 {offsets = [0, 0], sizes = [2, 32], strides = [1, 1]} : vector<2x33xf32> to vector<2x32xf32>
    %84 = vector.broadcast %82 : vector<2x1xf32> to vector<2x32xf32>
    %85 = arith.mulf %83, %84 : vector<2x32xf32>
    %c2_i32 = arith.constant 2 : i32
    %86 = arith.mulf %85, %85 : vector<2x32xf32>
    %cst_28 = arith.constant dense<0.000000e+00> : vector<2xf32>
    %87 = vector.multi_reduction <add>, %86, %cst_28 [1] : vector<2x32xf32> to vector<2xf32>
    %88 = vector.shape_cast %87 : vector<2xf32> to vector<2x1xf32>
    %cst_29 = arith.constant dense<0.000000e+00> : vector<2x8xf32>
    %89 = tpu.matmul %85, %0, %cst_29 {dimension_numbers = #tpu.dot_dimension_numbers<[1], [1], [0], [0], [0, 0, 1, 0], [], []>} : vector<2x32xf32>, vector<8x32xf32>, vector<2x8xf32> -> vector<2x8xf32>
    %90 = vector.broadcast %14 : vector<1x8xf32> to vector<2x8xf32>
    %91 = vector.broadcast %88 : vector<2x1xf32> to vector<2x8xf32>
    %92 = arith.addf %90, %91 : vector<2x8xf32>
    %cst_30 = arith.constant 2.000000e+00 : f32
    %93 = vector.broadcast %cst_30 : f32 to vector<2x8xf32>
    %94 = arith.mulf %93, %89 : vector<2x8xf32>
    %95 = arith.subf %92, %94 : vector<2x8xf32>
    %cst_31 = arith.constant 0.000000e+00 : f32
    %96 = vector.broadcast %cst_31 : f32 to vector<2x8xf32>
    %97 = arith.maximumf %95, %96 : vector<2x8xf32>
    %98 = math.sqrt %97 : vector<2x8xf32>
    %99 = vector.extract_strided_slice %98 {offsets = [1, 0], sizes = [1, 8], strides = [1, 1]} : vector<2x8xf32> to vector<1x8xf32>
    %100 = vector.extract_strided_slice %98 {offsets = [0, 0], sizes = [1, 8], strides = [1, 1]} : vector<2x8xf32> to vector<1x8xf32>
    %101 = arith.subf %99, %100 : vector<1x8xf32>
    %cst_32 = arith.constant 1.000000e+00 : f32
    %102 = vector.broadcast %cst_32 : f32 to vector<1x8xf32>
    %103 = arith.mulf %101, %102 : vector<1x8xf32>
    %104 = arith.negf %103 : vector<1x8xf32>
    %105 = math.exp %104 : vector<1x8xf32>
    %cst_33 = arith.constant 1.000000e+00 : f32
    %106 = vector.broadcast %cst_33 : f32 to vector<1x8xf32>
    %107 = arith.addf %106, %105 : vector<1x8xf32>
    %108 = arith.divf %106, %107 : vector<1x8xf32>
    %cst_34 = arith.constant dense<0.000000e+00> : vector<1x33xf32>
    %109 = tpu.matmul %108, %16, %cst_34 {dimension_numbers = #tpu.dot_dimension_numbers<[1], [0], [0], [1], [0, 0, 1, 1], [], []>} : vector<1x8xf32>, vector<8x33xf32>, vector<1x33xf32> -> vector<1x33xf32>
    %110 = arith.subf %18, %109 : vector<1x33xf32>
    %111 = tpu.concatenate %109, %110 in 0 : vector<1x33xf32>, vector<1x33xf32> -> vector<2x33xf32>
    %112 = vector.extract_strided_slice %111 {offsets = [0, 32], sizes = [2, 1], strides = [1, 1]} : vector<2x33xf32> to vector<2x1xf32>
    %cst_35 = arith.constant 9.99999997E-7 : f32
    %113 = vector.broadcast %cst_35 : f32 to vector<2x1xf32>
    %114 = arith.addf %112, %113 : vector<2x1xf32>
    %115 = tpu.reciprocal %114 {approx = true} : vector<2x1xf32> -> vector<2x1xf32>
    %116 = vector.extract_strided_slice %111 {offsets = [0, 0], sizes = [2, 32], strides = [1, 1]} : vector<2x33xf32> to vector<2x32xf32>
    %117 = vector.broadcast %115 : vector<2x1xf32> to vector<2x32xf32>
    %118 = arith.mulf %116, %117 : vector<2x32xf32>
    %c3_i32 = arith.constant 3 : i32
    %119 = arith.mulf %118, %118 : vector<2x32xf32>
    %cst_36 = arith.constant dense<0.000000e+00> : vector<2xf32>
    %120 = vector.multi_reduction <add>, %119, %cst_36 [1] : vector<2x32xf32> to vector<2xf32>
    %121 = vector.shape_cast %120 : vector<2xf32> to vector<2x1xf32>
    %cst_37 = arith.constant dense<0.000000e+00> : vector<2x8xf32>
    %122 = tpu.matmul %118, %0, %cst_37 {dimension_numbers = #tpu.dot_dimension_numbers<[1], [1], [0], [0], [0, 0, 1, 0], [], []>} : vector<2x32xf32>, vector<8x32xf32>, vector<2x8xf32> -> vector<2x8xf32>
    %123 = vector.broadcast %14 : vector<1x8xf32> to vector<2x8xf32>
    %124 = vector.broadcast %121 : vector<2x1xf32> to vector<2x8xf32>
    %125 = arith.addf %123, %124 : vector<2x8xf32>
    %cst_38 = arith.constant 2.000000e+00 : f32
    %126 = vector.broadcast %cst_38 : f32 to vector<2x8xf32>
    %127 = arith.mulf %126, %122 : vector<2x8xf32>
    %128 = arith.subf %125, %127 : vector<2x8xf32>
    %cst_39 = arith.constant 0.000000e+00 : f32
    %129 = vector.broadcast %cst_39 : f32 to vector<2x8xf32>
    %130 = arith.maximumf %128, %129 : vector<2x8xf32>
    %131 = math.sqrt %130 : vector<2x8xf32>
    %132 = vector.extract_strided_slice %131 {offsets = [1, 0], sizes = [1, 8], strides = [1, 1]} : vector<2x8xf32> to vector<1x8xf32>
    %133 = vector.extract_strided_slice %131 {offsets = [0, 0], sizes = [1, 8], strides = [1, 1]} : vector<2x8xf32> to vector<1x8xf32>
    %134 = arith.subf %132, %133 : vector<1x8xf32>
    %cst_40 = arith.constant 1.000000e+00 : f32
    %135 = vector.broadcast %cst_40 : f32 to vector<1x8xf32>
    %136 = arith.mulf %134, %135 : vector<1x8xf32>
    %137 = arith.negf %136 : vector<1x8xf32>
    %138 = math.exp %137 : vector<1x8xf32>
    %cst_41 = arith.constant 1.000000e+00 : f32
    %139 = vector.broadcast %cst_41 : f32 to vector<1x8xf32>
    %140 = arith.addf %139, %138 : vector<1x8xf32>
    %141 = arith.divf %139, %140 : vector<1x8xf32>
    %cst_42 = arith.constant dense<0.000000e+00> : vector<1x33xf32>
    %142 = tpu.matmul %141, %16, %cst_42 {dimension_numbers = #tpu.dot_dimension_numbers<[1], [0], [0], [1], [0, 0, 1, 1], [], []>} : vector<1x8xf32>, vector<8x33xf32>, vector<1x33xf32> -> vector<1x33xf32>
    %143 = arith.subf %18, %142 : vector<1x33xf32>
    %144 = tpu.concatenate %142, %143 in 0 : vector<1x33xf32>, vector<1x33xf32> -> vector<2x33xf32>
    %145 = vector.extract_strided_slice %144 {offsets = [0, 32], sizes = [2, 1], strides = [1, 1]} : vector<2x33xf32> to vector<2x1xf32>
    %cst_43 = arith.constant 9.99999997E-7 : f32
    %146 = vector.broadcast %cst_43 : f32 to vector<2x1xf32>
    %147 = arith.addf %145, %146 : vector<2x1xf32>
    %148 = tpu.reciprocal %147 {approx = true} : vector<2x1xf32> -> vector<2x1xf32>
    %149 = vector.extract_strided_slice %144 {offsets = [0, 0], sizes = [2, 32], strides = [1, 1]} : vector<2x33xf32> to vector<2x32xf32>
    %150 = vector.broadcast %148 : vector<2x1xf32> to vector<2x32xf32>
    %151 = arith.mulf %149, %150 : vector<2x32xf32>
    %c4_i32 = arith.constant 4 : i32
    %152 = arith.mulf %151, %151 : vector<2x32xf32>
    %cst_44 = arith.constant dense<0.000000e+00> : vector<2xf32>
    %153 = vector.multi_reduction <add>, %152, %cst_44 [1] : vector<2x32xf32> to vector<2xf32>
    %154 = vector.shape_cast %153 : vector<2xf32> to vector<2x1xf32>
    %cst_45 = arith.constant dense<0.000000e+00> : vector<2x8xf32>
    %155 = tpu.matmul %151, %0, %cst_45 {dimension_numbers = #tpu.dot_dimension_numbers<[1], [1], [0], [0], [0, 0, 1, 0], [], []>} : vector<2x32xf32>, vector<8x32xf32>, vector<2x8xf32> -> vector<2x8xf32>
    %156 = vector.broadcast %14 : vector<1x8xf32> to vector<2x8xf32>
    %157 = vector.broadcast %154 : vector<2x1xf32> to vector<2x8xf32>
    %158 = arith.addf %156, %157 : vector<2x8xf32>
    %cst_46 = arith.constant 2.000000e+00 : f32
    %159 = vector.broadcast %cst_46 : f32 to vector<2x8xf32>
    %160 = arith.mulf %159, %155 : vector<2x8xf32>
    %161 = arith.subf %158, %160 : vector<2x8xf32>
    %cst_47 = arith.constant 0.000000e+00 : f32
    %162 = vector.broadcast %cst_47 : f32 to vector<2x8xf32>
    %163 = arith.maximumf %161, %162 : vector<2x8xf32>
    %164 = math.sqrt %163 : vector<2x8xf32>
    %165 = vector.extract_strided_slice %164 {offsets = [1, 0], sizes = [1, 8], strides = [1, 1]} : vector<2x8xf32> to vector<1x8xf32>
    %166 = vector.extract_strided_slice %164 {offsets = [0, 0], sizes = [1, 8], strides = [1, 1]} : vector<2x8xf32> to vector<1x8xf32>
    %167 = arith.subf %165, %166 : vector<1x8xf32>
    %cst_48 = arith.constant 1.000000e+00 : f32
    %168 = vector.broadcast %cst_48 : f32 to vector<1x8xf32>
    %169 = arith.mulf %167, %168 : vector<1x8xf32>
    %170 = arith.negf %169 : vector<1x8xf32>
    %171 = math.exp %170 : vector<1x8xf32>
    %cst_49 = arith.constant 1.000000e+00 : f32
    %172 = vector.broadcast %cst_49 : f32 to vector<1x8xf32>
    %173 = arith.addf %172, %171 : vector<1x8xf32>
    %174 = arith.divf %172, %173 : vector<1x8xf32>
    %cst_50 = arith.constant dense<0.000000e+00> : vector<1x33xf32>
    %175 = tpu.matmul %174, %16, %cst_50 {dimension_numbers = #tpu.dot_dimension_numbers<[1], [0], [0], [1], [0, 0, 1, 1], [], []>} : vector<1x8xf32>, vector<8x33xf32>, vector<1x33xf32> -> vector<1x33xf32>
    %176 = arith.subf %18, %175 : vector<1x33xf32>
    %177 = tpu.concatenate %175, %176 in 0 : vector<1x33xf32>, vector<1x33xf32> -> vector<2x33xf32>
    %178 = vector.extract_strided_slice %177 {offsets = [0, 32], sizes = [2, 1], strides = [1, 1]} : vector<2x33xf32> to vector<2x1xf32>
    %cst_51 = arith.constant 9.99999997E-7 : f32
    %179 = vector.broadcast %cst_51 : f32 to vector<2x1xf32>
    %180 = arith.addf %178, %179 : vector<2x1xf32>
    %181 = tpu.reciprocal %180 {approx = true} : vector<2x1xf32> -> vector<2x1xf32>
    %182 = vector.extract_strided_slice %177 {offsets = [0, 0], sizes = [2, 32], strides = [1, 1]} : vector<2x33xf32> to vector<2x32xf32>
    %183 = vector.broadcast %181 : vector<2x1xf32> to vector<2x32xf32>
    %184 = arith.mulf %182, %183 : vector<2x32xf32>
    %c5_i32 = arith.constant 5 : i32
    %185 = arith.mulf %184, %184 : vector<2x32xf32>
    %cst_52 = arith.constant dense<0.000000e+00> : vector<2xf32>
    %186 = vector.multi_reduction <add>, %185, %cst_52 [1] : vector<2x32xf32> to vector<2xf32>
    %187 = vector.shape_cast %186 : vector<2xf32> to vector<2x1xf32>
    %cst_53 = arith.constant dense<0.000000e+00> : vector<2x8xf32>
    %188 = tpu.matmul %184, %0, %cst_53 {dimension_numbers = #tpu.dot_dimension_numbers<[1], [1], [0], [0], [0, 0, 1, 0], [], []>} : vector<2x32xf32>, vector<8x32xf32>, vector<2x8xf32> -> vector<2x8xf32>
    %189 = vector.broadcast %14 : vector<1x8xf32> to vector<2x8xf32>
    %190 = vector.broadcast %187 : vector<2x1xf32> to vector<2x8xf32>
    %191 = arith.addf %189, %190 : vector<2x8xf32>
    %cst_54 = arith.constant 2.000000e+00 : f32
    %192 = vector.broadcast %cst_54 : f32 to vector<2x8xf32>
    %193 = arith.mulf %192, %188 : vector<2x8xf32>
    %194 = arith.subf %191, %193 : vector<2x8xf32>
    %cst_55 = arith.constant 0.000000e+00 : f32
    %195 = vector.broadcast %cst_55 : f32 to vector<2x8xf32>
    %196 = arith.maximumf %194, %195 : vector<2x8xf32>
    %197 = math.sqrt %196 : vector<2x8xf32>
    %198 = vector.extract_strided_slice %197 {offsets = [1, 0], sizes = [1, 8], strides = [1, 1]} : vector<2x8xf32> to vector<1x8xf32>
    %199 = vector.extract_strided_slice %197 {offsets = [0, 0], sizes = [1, 8], strides = [1, 1]} : vector<2x8xf32> to vector<1x8xf32>
    %200 = arith.subf %198, %199 : vector<1x8xf32>
    %cst_56 = arith.constant 1.000000e+00 : f32
    %201 = vector.broadcast %cst_56 : f32 to vector<1x8xf32>
    %202 = arith.mulf %200, %201 : vector<1x8xf32>
    %203 = arith.negf %202 : vector<1x8xf32>
    %204 = math.exp %203 : vector<1x8xf32>
    %cst_57 = arith.constant 1.000000e+00 : f32
    %205 = vector.broadcast %cst_57 : f32 to vector<1x8xf32>
    %206 = arith.addf %205, %204 : vector<1x8xf32>
    %207 = arith.divf %205, %206 : vector<1x8xf32>
    %cst_58 = arith.constant dense<0.000000e+00> : vector<1x33xf32>
    %208 = tpu.matmul %207, %16, %cst_58 {dimension_numbers = #tpu.dot_dimension_numbers<[1], [0], [0], [1], [0, 0, 1, 1], [], []>} : vector<1x8xf32>, vector<8x33xf32>, vector<1x33xf32> -> vector<1x33xf32>
    %209 = arith.subf %18, %208 : vector<1x33xf32>
    %210 = tpu.concatenate %208, %209 in 0 : vector<1x33xf32>, vector<1x33xf32> -> vector<2x33xf32>
    %211 = vector.extract_strided_slice %210 {offsets = [0, 32], sizes = [2, 1], strides = [1, 1]} : vector<2x33xf32> to vector<2x1xf32>
    %cst_59 = arith.constant 9.99999997E-7 : f32
    %212 = vector.broadcast %cst_59 : f32 to vector<2x1xf32>
    %213 = arith.addf %211, %212 : vector<2x1xf32>
    %214 = tpu.reciprocal %213 {approx = true} : vector<2x1xf32> -> vector<2x1xf32>
    %215 = vector.extract_strided_slice %210 {offsets = [0, 0], sizes = [2, 32], strides = [1, 1]} : vector<2x33xf32> to vector<2x32xf32>
    %216 = vector.broadcast %214 : vector<2x1xf32> to vector<2x32xf32>
    %217 = arith.mulf %215, %216 : vector<2x32xf32>
    %c6_i32 = arith.constant 6 : i32
    %218 = arith.mulf %217, %217 : vector<2x32xf32>
    %cst_60 = arith.constant dense<0.000000e+00> : vector<2xf32>
    %219 = vector.multi_reduction <add>, %218, %cst_60 [1] : vector<2x32xf32> to vector<2xf32>
    %220 = vector.shape_cast %219 : vector<2xf32> to vector<2x1xf32>
    %cst_61 = arith.constant dense<0.000000e+00> : vector<2x8xf32>
    %221 = tpu.matmul %217, %0, %cst_61 {dimension_numbers = #tpu.dot_dimension_numbers<[1], [1], [0], [0], [0, 0, 1, 0], [], []>} : vector<2x32xf32>, vector<8x32xf32>, vector<2x8xf32> -> vector<2x8xf32>
    %222 = vector.broadcast %14 : vector<1x8xf32> to vector<2x8xf32>
    %223 = vector.broadcast %220 : vector<2x1xf32> to vector<2x8xf32>
    %224 = arith.addf %222, %223 : vector<2x8xf32>
    %cst_62 = arith.constant 2.000000e+00 : f32
    %225 = vector.broadcast %cst_62 : f32 to vector<2x8xf32>
    %226 = arith.mulf %225, %221 : vector<2x8xf32>
    %227 = arith.subf %224, %226 : vector<2x8xf32>
    %cst_63 = arith.constant 0.000000e+00 : f32
    %228 = vector.broadcast %cst_63 : f32 to vector<2x8xf32>
    %229 = arith.maximumf %227, %228 : vector<2x8xf32>
    %230 = math.sqrt %229 : vector<2x8xf32>
    %231 = vector.extract_strided_slice %230 {offsets = [1, 0], sizes = [1, 8], strides = [1, 1]} : vector<2x8xf32> to vector<1x8xf32>
    %232 = vector.extract_strided_slice %230 {offsets = [0, 0], sizes = [1, 8], strides = [1, 1]} : vector<2x8xf32> to vector<1x8xf32>
    %233 = arith.subf %231, %232 : vector<1x8xf32>
    %cst_64 = arith.constant 1.000000e+00 : f32
    %234 = vector.broadcast %cst_64 : f32 to vector<1x8xf32>
    %235 = arith.mulf %233, %234 : vector<1x8xf32>
    %236 = arith.negf %235 : vector<1x8xf32>
    %237 = math.exp %236 : vector<1x8xf32>
    %cst_65 = arith.constant 1.000000e+00 : f32
    %238 = vector.broadcast %cst_65 : f32 to vector<1x8xf32>
    %239 = arith.addf %238, %237 : vector<1x8xf32>
    %240 = arith.divf %238, %239 : vector<1x8xf32>
    %cst_66 = arith.constant dense<0.000000e+00> : vector<1x33xf32>
    %241 = tpu.matmul %240, %16, %cst_66 {dimension_numbers = #tpu.dot_dimension_numbers<[1], [0], [0], [1], [0, 0, 1, 1], [], []>} : vector<1x8xf32>, vector<8x33xf32>, vector<1x33xf32> -> vector<1x33xf32>
    %242 = arith.subf %18, %241 : vector<1x33xf32>
    %243 = tpu.concatenate %241, %242 in 0 : vector<1x33xf32>, vector<1x33xf32> -> vector<2x33xf32>
    %244 = vector.extract_strided_slice %243 {offsets = [0, 32], sizes = [2, 1], strides = [1, 1]} : vector<2x33xf32> to vector<2x1xf32>
    %cst_67 = arith.constant 9.99999997E-7 : f32
    %245 = vector.broadcast %cst_67 : f32 to vector<2x1xf32>
    %246 = arith.addf %244, %245 : vector<2x1xf32>
    %247 = tpu.reciprocal %246 {approx = true} : vector<2x1xf32> -> vector<2x1xf32>
    %248 = vector.extract_strided_slice %243 {offsets = [0, 0], sizes = [2, 32], strides = [1, 1]} : vector<2x33xf32> to vector<2x32xf32>
    %249 = vector.broadcast %247 : vector<2x1xf32> to vector<2x32xf32>
    %250 = arith.mulf %248, %249 : vector<2x32xf32>
    %c7_i32 = arith.constant 7 : i32
    %251 = arith.mulf %250, %250 : vector<2x32xf32>
    %cst_68 = arith.constant dense<0.000000e+00> : vector<2xf32>
    %252 = vector.multi_reduction <add>, %251, %cst_68 [1] : vector<2x32xf32> to vector<2xf32>
    %253 = vector.shape_cast %252 : vector<2xf32> to vector<2x1xf32>
    %cst_69 = arith.constant dense<0.000000e+00> : vector<2x8xf32>
    %254 = tpu.matmul %250, %0, %cst_69 {dimension_numbers = #tpu.dot_dimension_numbers<[1], [1], [0], [0], [0, 0, 1, 0], [], []>} : vector<2x32xf32>, vector<8x32xf32>, vector<2x8xf32> -> vector<2x8xf32>
    %255 = vector.broadcast %14 : vector<1x8xf32> to vector<2x8xf32>
    %256 = vector.broadcast %253 : vector<2x1xf32> to vector<2x8xf32>
    %257 = arith.addf %255, %256 : vector<2x8xf32>
    %cst_70 = arith.constant 2.000000e+00 : f32
    %258 = vector.broadcast %cst_70 : f32 to vector<2x8xf32>
    %259 = arith.mulf %258, %254 : vector<2x8xf32>
    %260 = arith.subf %257, %259 : vector<2x8xf32>
    %cst_71 = arith.constant 0.000000e+00 : f32
    %261 = vector.broadcast %cst_71 : f32 to vector<2x8xf32>
    %262 = arith.maximumf %260, %261 : vector<2x8xf32>
    %263 = math.sqrt %262 : vector<2x8xf32>
    %264 = vector.extract_strided_slice %263 {offsets = [1, 0], sizes = [1, 8], strides = [1, 1]} : vector<2x8xf32> to vector<1x8xf32>
    %265 = vector.extract_strided_slice %263 {offsets = [0, 0], sizes = [1, 8], strides = [1, 1]} : vector<2x8xf32> to vector<1x8xf32>
    %266 = arith.subf %264, %265 : vector<1x8xf32>
    %cst_72 = arith.constant 1.000000e+00 : f32
    %267 = vector.broadcast %cst_72 : f32 to vector<1x8xf32>
    %268 = arith.mulf %266, %267 : vector<1x8xf32>
    %269 = arith.negf %268 : vector<1x8xf32>
    %270 = math.exp %269 : vector<1x8xf32>
    %cst_73 = arith.constant 1.000000e+00 : f32
    %271 = vector.broadcast %cst_73 : f32 to vector<1x8xf32>
    %272 = arith.addf %271, %270 : vector<1x8xf32>
    %273 = arith.divf %271, %272 : vector<1x8xf32>
    %cst_74 = arith.constant dense<0.000000e+00> : vector<1x33xf32>
    %274 = tpu.matmul %273, %16, %cst_74 {dimension_numbers = #tpu.dot_dimension_numbers<[1], [0], [0], [1], [0, 0, 1, 1], [], []>} : vector<1x8xf32>, vector<8x33xf32>, vector<1x33xf32> -> vector<1x33xf32>
    %275 = arith.subf %18, %274 : vector<1x33xf32>
    %276 = tpu.concatenate %274, %275 in 0 : vector<1x33xf32>, vector<1x33xf32> -> vector<2x33xf32>
    %277 = vector.extract_strided_slice %276 {offsets = [0, 32], sizes = [2, 1], strides = [1, 1]} : vector<2x33xf32> to vector<2x1xf32>
    %cst_75 = arith.constant 9.99999997E-7 : f32
    %278 = vector.broadcast %cst_75 : f32 to vector<2x1xf32>
    %279 = arith.addf %277, %278 : vector<2x1xf32>
    %280 = tpu.reciprocal %279 {approx = true} : vector<2x1xf32> -> vector<2x1xf32>
    %281 = vector.extract_strided_slice %276 {offsets = [0, 0], sizes = [2, 32], strides = [1, 1]} : vector<2x33xf32> to vector<2x32xf32>
    %282 = vector.broadcast %280 : vector<2x1xf32> to vector<2x32xf32>
    %283 = arith.mulf %281, %282 : vector<2x32xf32>
    %c8_i32 = arith.constant 8 : i32
    %284 = arith.mulf %283, %283 : vector<2x32xf32>
    %cst_76 = arith.constant dense<0.000000e+00> : vector<2xf32>
    %285 = vector.multi_reduction <add>, %284, %cst_76 [1] : vector<2x32xf32> to vector<2xf32>
    %286 = vector.shape_cast %285 : vector<2xf32> to vector<2x1xf32>
    %cst_77 = arith.constant dense<0.000000e+00> : vector<2x8xf32>
    %287 = tpu.matmul %283, %0, %cst_77 {dimension_numbers = #tpu.dot_dimension_numbers<[1], [1], [0], [0], [0, 0, 1, 0], [], []>} : vector<2x32xf32>, vector<8x32xf32>, vector<2x8xf32> -> vector<2x8xf32>
    %288 = vector.broadcast %14 : vector<1x8xf32> to vector<2x8xf32>
    %289 = vector.broadcast %286 : vector<2x1xf32> to vector<2x8xf32>
    %290 = arith.addf %288, %289 : vector<2x8xf32>
    %cst_78 = arith.constant 2.000000e+00 : f32
    %291 = vector.broadcast %cst_78 : f32 to vector<2x8xf32>
    %292 = arith.mulf %291, %287 : vector<2x8xf32>
    %293 = arith.subf %290, %292 : vector<2x8xf32>
    %cst_79 = arith.constant 0.000000e+00 : f32
    %294 = vector.broadcast %cst_79 : f32 to vector<2x8xf32>
    %295 = arith.maximumf %293, %294 : vector<2x8xf32>
    %296 = math.sqrt %295 : vector<2x8xf32>
    %297 = vector.extract_strided_slice %296 {offsets = [1, 0], sizes = [1, 8], strides = [1, 1]} : vector<2x8xf32> to vector<1x8xf32>
    %298 = vector.extract_strided_slice %296 {offsets = [0, 0], sizes = [1, 8], strides = [1, 1]} : vector<2x8xf32> to vector<1x8xf32>
    %299 = arith.subf %297, %298 : vector<1x8xf32>
    %cst_80 = arith.constant 1.000000e+00 : f32
    %300 = vector.broadcast %cst_80 : f32 to vector<1x8xf32>
    %301 = arith.mulf %299, %300 : vector<1x8xf32>
    %302 = arith.negf %301 : vector<1x8xf32>
    %303 = math.exp %302 : vector<1x8xf32>
    %cst_81 = arith.constant 1.000000e+00 : f32
    %304 = vector.broadcast %cst_81 : f32 to vector<1x8xf32>
    %305 = arith.addf %304, %303 : vector<1x8xf32>
    %306 = arith.divf %304, %305 : vector<1x8xf32>
    %cst_82 = arith.constant dense<0.000000e+00> : vector<1x33xf32>
    %307 = tpu.matmul %306, %16, %cst_82 {dimension_numbers = #tpu.dot_dimension_numbers<[1], [0], [0], [1], [0, 0, 1, 1], [], []>} : vector<1x8xf32>, vector<8x33xf32>, vector<1x33xf32> -> vector<1x33xf32>
    %308 = arith.subf %18, %307 : vector<1x33xf32>
    %309 = tpu.concatenate %307, %308 in 0 : vector<1x33xf32>, vector<1x33xf32> -> vector<2x33xf32>
    %310 = vector.extract_strided_slice %309 {offsets = [0, 32], sizes = [2, 1], strides = [1, 1]} : vector<2x33xf32> to vector<2x1xf32>
    %cst_83 = arith.constant 9.99999997E-7 : f32
    %311 = vector.broadcast %cst_83 : f32 to vector<2x1xf32>
    %312 = arith.addf %310, %311 : vector<2x1xf32>
    %313 = tpu.reciprocal %312 {approx = true} : vector<2x1xf32> -> vector<2x1xf32>
    %314 = vector.extract_strided_slice %309 {offsets = [0, 0], sizes = [2, 32], strides = [1, 1]} : vector<2x33xf32> to vector<2x32xf32>
    %315 = vector.broadcast %313 : vector<2x1xf32> to vector<2x32xf32>
    %316 = arith.mulf %314, %315 : vector<2x32xf32>
    %c9_i32 = arith.constant 9 : i32
    %317 = arith.mulf %316, %316 : vector<2x32xf32>
    %cst_84 = arith.constant dense<0.000000e+00> : vector<2xf32>
    %318 = vector.multi_reduction <add>, %317, %cst_84 [1] : vector<2x32xf32> to vector<2xf32>
    %319 = vector.shape_cast %318 : vector<2xf32> to vector<2x1xf32>
    %cst_85 = arith.constant dense<0.000000e+00> : vector<2x8xf32>
    %320 = tpu.matmul %316, %0, %cst_85 {dimension_numbers = #tpu.dot_dimension_numbers<[1], [1], [0], [0], [0, 0, 1, 0], [], []>} : vector<2x32xf32>, vector<8x32xf32>, vector<2x8xf32> -> vector<2x8xf32>
    %321 = vector.broadcast %14 : vector<1x8xf32> to vector<2x8xf32>
    %322 = vector.broadcast %319 : vector<2x1xf32> to vector<2x8xf32>
    %323 = arith.addf %321, %322 : vector<2x8xf32>
    %cst_86 = arith.constant 2.000000e+00 : f32
    %324 = vector.broadcast %cst_86 : f32 to vector<2x8xf32>
    %325 = arith.mulf %324, %320 : vector<2x8xf32>
    %326 = arith.subf %323, %325 : vector<2x8xf32>
    %cst_87 = arith.constant 0.000000e+00 : f32
    %327 = vector.broadcast %cst_87 : f32 to vector<2x8xf32>
    %328 = arith.maximumf %326, %327 : vector<2x8xf32>
    %329 = math.sqrt %328 : vector<2x8xf32>
    %330 = vector.extract_strided_slice %329 {offsets = [1, 0], sizes = [1, 8], strides = [1, 1]} : vector<2x8xf32> to vector<1x8xf32>
    %331 = vector.extract_strided_slice %329 {offsets = [0, 0], sizes = [1, 8], strides = [1, 1]} : vector<2x8xf32> to vector<1x8xf32>
    %332 = arith.subf %330, %331 : vector<1x8xf32>
    %cst_88 = arith.constant 1.000000e+00 : f32
    %333 = vector.broadcast %cst_88 : f32 to vector<1x8xf32>
    %334 = arith.mulf %332, %333 : vector<1x8xf32>
    %335 = arith.negf %334 : vector<1x8xf32>
    %336 = math.exp %335 : vector<1x8xf32>
    %cst_89 = arith.constant 1.000000e+00 : f32
    %337 = vector.broadcast %cst_89 : f32 to vector<1x8xf32>
    %338 = arith.addf %337, %336 : vector<1x8xf32>
    %339 = arith.divf %337, %338 : vector<1x8xf32>
    %cst_90 = arith.constant dense<0.000000e+00> : vector<1x33xf32>
    %340 = tpu.matmul %339, %16, %cst_90 {dimension_numbers = #tpu.dot_dimension_numbers<[1], [0], [0], [1], [0, 0, 1, 1], [], []>} : vector<1x8xf32>, vector<8x33xf32>, vector<1x33xf32> -> vector<1x33xf32>
    %341 = arith.subf %18, %340 : vector<1x33xf32>
    %342 = tpu.concatenate %340, %341 in 0 : vector<1x33xf32>, vector<1x33xf32> -> vector<2x33xf32>
    %343 = vector.extract_strided_slice %342 {offsets = [0, 32], sizes = [2, 1], strides = [1, 1]} : vector<2x33xf32> to vector<2x1xf32>
    %cst_91 = arith.constant 9.99999997E-7 : f32
    %344 = vector.broadcast %cst_91 : f32 to vector<2x1xf32>
    %345 = arith.addf %343, %344 : vector<2x1xf32>
    %346 = tpu.reciprocal %345 {approx = true} : vector<2x1xf32> -> vector<2x1xf32>
    %347 = vector.extract_strided_slice %342 {offsets = [0, 0], sizes = [2, 32], strides = [1, 1]} : vector<2x33xf32> to vector<2x32xf32>
    %348 = vector.broadcast %346 : vector<2x1xf32> to vector<2x32xf32>
    %349 = arith.mulf %347, %348 : vector<2x32xf32>
    %c0_92 = arith.constant 0 : index
    %c0_93 = arith.constant 0 : index
    %350 = vector.load %arg4[%c0_92, %c0_93] : memref<2x32xf32, #tpu.memory_space<vmem>>, vector<2x32xf32>
    tpu.vector_store %arg4[%c0_92, %c0_93], %349 {strides = array<i32>} : memref<2x32xf32, #tpu.memory_space<vmem>>, vector<2x32xf32>,
    %351 = arith.mulf %349, %349 : vector<2x32xf32>
    %cst_94 = arith.constant dense<0.000000e+00> : vector<2xf32>
    %352 = vector.multi_reduction <add>, %351, %cst_94 [1] : vector<2x32xf32> to vector<2xf32>
    %353 = vector.shape_cast %352 : vector<2xf32> to vector<2x1xf32>
    %cst_95 = arith.constant dense<0.000000e+00> : vector<2x8xf32>
    %354 = tpu.matmul %349, %0, %cst_95 {dimension_numbers = #tpu.dot_dimension_numbers<[1], [1], [0], [0], [0, 0, 1, 0], [], []>} : vector<2x32xf32>, vector<8x32xf32>, vector<2x8xf32> -> vector<2x8xf32>
    %355 = vector.broadcast %14 : vector<1x8xf32> to vector<2x8xf32>
    %356 = vector.broadcast %353 : vector<2x1xf32> to vector<2x8xf32>
    %357 = arith.addf %355, %356 : vector<2x8xf32>
    %cst_96 = arith.constant 2.000000e+00 : f32
    %358 = vector.broadcast %cst_96 : f32 to vector<2x8xf32>
    %359 = arith.mulf %358, %354 : vector<2x8xf32>
    %360 = arith.subf %357, %359 : vector<2x8xf32>
    %cst_97 = arith.constant 0.000000e+00 : f32
    %361 = vector.broadcast %cst_97 : f32 to vector<2x8xf32>
    %362 = arith.maximumf %360, %361 : vector<2x8xf32>
    %363 = math.sqrt %362 : vector<2x8xf32>
    %364 = vector.extract_strided_slice %363 {offsets = [1, 0], sizes = [1, 8], strides = [1, 1]} : vector<2x8xf32> to vector<1x8xf32>
    %365 = vector.extract_strided_slice %363 {offsets = [0, 0], sizes = [1, 8], strides = [1, 1]} : vector<2x8xf32> to vector<1x8xf32>
    %366 = arith.subf %364, %365 : vector<1x8xf32>
    %cst_98 = arith.constant 1.000000e+00 : f32
    %367 = vector.broadcast %cst_98 : f32 to vector<1x8xf32>
    %368 = arith.mulf %366, %367 : vector<1x8xf32>
    %369 = arith.negf %368 : vector<1x8xf32>
    %370 = math.exp %369 : vector<1x8xf32>
    %cst_99 = arith.constant 1.000000e+00 : f32
    %371 = vector.broadcast %cst_99 : f32 to vector<1x8xf32>
    %372 = arith.addf %371, %370 : vector<1x8xf32>
    %373 = arith.divf %371, %372 : vector<1x8xf32>
    %cst_100 = arith.constant 1.000000e+00 : f32
    %374 = vector.broadcast %cst_100 : f32 to vector<1x8xf32>
    %375 = arith.subf %374, %373 : vector<1x8xf32>
    %376 = tpu.concatenate %373, %375 in 0 : vector<1x8xf32>, vector<1x8xf32> -> vector<2x8xf32>
    %c0_101 = arith.constant 0 : index
    %c0_102 = arith.constant 0 : index
    %377 = vector.load %arg5[%c0_101, %c0_102] : memref<2x8xf32, #tpu.memory_space<vmem>>, vector<2x8xf32>
    tpu.vector_store %arg5[%c0_101, %c0_102], %376 {strides = array<i32>} : memref<2x8xf32, #tpu.memory_space<vmem>>, vector<2x8xf32>,
    return
  }
}

</mosaic_0001>

<bundles_post_ra>
// kernel: mono_sbert_binary_qsc_forward.1
= control target key start
LH: loop header
LB: loop body
LE: loop exit
PB: predicated region body
PF: predicated region fallthrough
CT: control target
= control target key end

     0   :  { %12 = vsyncpa [#allocation4], 0  ;;  %s2964_s0 = inlined_call_operand.hbm [shape: f32[8,32], index: 0, kind: input, shape index: {}]   ;;  %s2965_s1 = inlined_call_operand.vmem [shape: f32[1,32], index: 1, kind: input, shape index: {}]   ;;  %s2966_s2 = inlined_call_operand.<no memory space> [shape: f32[1], index: 2, kind: input, shape index: {}]   ;;  %s2967_s3 = inlined_call_operand.hbm [shape: f32[1,8], index: 3, kind: output, shape index: {0}]   ;;  %s2968_s4 = inlined_call_operand.hbm [shape: f32[2,32], index: 4, kind: output, shape index: {1}]   ;;  %s2969_s5 = inlined_call_operand.hbm [shape: f32[2,8], index: 5, kind: output, shape index: {2}]  }
   0x1   :  { %13 = vsyncpa [#allocation5], 0 }
   0x2   :  { %14 = vsyncpa [#allocation8], 0  ;;  %s2683_s18 = smov [#allocation3]   ;;  %s2589_s22 = scalar_lea.hbm %s2964_s0, 128 }
   0x3   :  { %s21_s19 = sshll.u32 %s2683_s18, 4  ;;  %p2590_p0 = scmp.ne.s32.totalorder %s2964_s0, %s2589_s22  ;;  %s22_s19 = int_to_ptr.vmem [resolvable:$true] %s21_s19 }
   0x4   :  { %p2593_p1 = scmp.lt.u32.totalorder %s2589_s22, %s2964_s0 }
   0x6   :  { %p2595_p2 = pnand %p2593_p1, %p2590_p0 }
   0x8   :  { %2598 = shalt.err (!%p2595_p2)
}
   0x9   :  { %s2599_s27 = scalar_lea.vmem %s22_s19, 128  ;;  %p2604_p4 = scmp.lt.s32.totalorder %s22_s19, %s22_s19 }
   0xa   :  { %p2600_p3 = scmp.ne.s32.totalorder %s22_s19, %s2599_s27  ;;  %p2605_p5 = scmp.lt.s32.totalorder %s2599_s27, %s2599_s27 }
   0xc   :  { %p2606_p6 = por %p2605_p5, %p2604_p4 }
   0xe   :  { %p2607_p7 = pnand %p2606_p6, %p2600_p3 }
  0x10   :  { %2610 = shalt.err (!%p2607_p7)
}
  0x11   :  { %24 = dma.hbm_to_vmem [thread:$0]  %s2964_s0, 128, %s22_s19, [#allocation4]  }
  0x12   :  { %2677 = dma.done.wait [#allocation4], 128  }
  0x13   :  { %2678 = vsyncadd [#allocation4], 4294967168  ;;  %v2684_v0 = vmov 0.0   ;;  %vm2685_vm0 = vmmov 0   ;;  %v2739_v1 = vld [vmem:[#allocation3] sm:$0xff]  ;;  %vm36_vm1 = vcmask 261120   ;;  %v346_v7 = vlaneseq }
  0x14   :  { %2374 = vmatprep.subr.mxu1 %v2684_v0  ;;  %2376 = vmatprep.mubr.msk.f32.mxu1 %vm2685_vm0, %v2684_v0  ;;  %vm272_vm2 = vcmask 254976   ;;  %v121_v2 = vmul.f32 %v2739_v1, %v2739_v1  ;;  %v2686_v4 = vmov 1.0   ;;  %v33_v5 = vld [vmem:[%s2965_s1] sm:$0x1]  ;;  %v2767_v6 = vsel %vm36_vm1, %v2739_v1, 1.0  ;;  %s2689_s8 = smov [#allocation6]  }
  0x15   :  { %2369 = vmatprep.subr.mxu0 %v2684_v0  ;;  %2371 = vmatprep.mubr.msk.f32.mxu0 %vm2685_vm0, %v2684_v0  ;;  %vm199_vm3 = vcmask 64512   ;;  %v347_v8 = vshrl.u32 %v346_v7, 7  ;;  %v35_v36 = vstv %s2966_s2  ;;  %v2687_v41 = vmov 32   ;;  %s2688_s2 = smov [#allocation7]   ;;  %s2236_s9 = sshll.u32 %s2689_s8, 4  ;;  %s2237_s9 = int_to_ptr.vmem [resolvable:$true] %s2236_s9 }
  0x16   :  { %2370 = vmatpush3.xpose.msk.msra.mxu0 %vm36_vm1, %v2739_v1  ;;  %2375 = vmatpush3.xpose.msk.msra.mxu1 %vm36_vm1, %v121_v2  ;;  %v273_v3 = vsel %vm272_vm2, %v121_v2, 0.0  ;;  %vm119_vm6 = vcmask 57344   ;;  %vm449_vm7 = vcmask 1040384   ;;  %s2246_s7 = sshll.u32 %s2688_s2, 4  ;;  %s2247_s7 = int_to_ptr.vmem [resolvable:$true] %s2246_s7 }
  0x17   :  { %2379 = vmatprep.subr.mxu0 %v2684_v0  ;;  %2384 = vmatprep.subr.mxu1 %v2684_v0  ;;  %v348_v9 = vsub.s32 0, %v347_v8  ;;  %s2611_s10 = scalar_lea.vmem %s2247_s7, 32  ;;  %p2616_p9 = scmp.lt.s32.totalorder %s2247_s7, %s2247_s7 }
  0x18   :  { %274 = vadd.xlane.f32.xlu0 %v273_v3  ;;  %2498 = vset.pattern.permute.xlu1 %v2687_v41  ;;  %p2612_p8 = scmp.ne.s32.totalorder %s2247_s7, %s2611_s10  ;;  %p2617_p10 = scmp.lt.s32.totalorder %s2611_s10, %s2611_s10 }
  0x19   :  { %2377 = vmatmul.mubr.msk.f32.vlgmr.msra.gmra.mrb[0].mxu1 %vm36_vm1, %v2686_v4  ;;  %2372 = vmatmul.mubr.msk.f32.vlgmr.msra.gmra.mrb[0].mxu0 %vm36_vm1, %v33_v5 }
  0x1a   :  { %2385 = vmatpush3.xpose.msk.msra.mxu1 %vm36_vm1, %v2739_v1  ;;  %2386 = vmatprep.mubr.msk.f32.mxu1 %vm2685_vm0, %v2684_v0  ;;  %p2618_p11 = por %p2617_p10, %p2616_p9 }
  0x1b   :  { %2394 = vmatprep.subr.mxu1 %v2684_v0  ;;  %2380 = vmatpush3.msra.mxu0 %v2767_v6 }
  0x1c   :  { %2381 = vmatprep.mubr.msk.f32.mxu0 %vm2685_vm0, %v2684_v0  ;;  %2389 = vmatprep.subr.mxu0 %v2684_v0  ;;  %p2619_p12 = pnand %p2618_p11, %p2612_p8 }
  0x1d   :  { %2387 = vmatmul.mubr.msk.f32.vlgmr.msra.gmra.mrb[2].mxu1 %vm36_vm1, %v2739_v1  ;;  %2382 = vmatmul.mubr.msk.f32.vlgmr.msra.gmra.mrb[2].mxu0 %vm199_vm3, %v2686_v4 }
  0x1e   :  { %2395 = vmatpush3.xpose.msk.msra.mxu1 %vm36_vm1, %v2739_v1  ;;  %2396 = vmatprep.mubr.msk.f32.mxu1 %vm2685_vm0, %v2684_v0 }
  0x1f   :  { %2404 = vmatprep.subr.mxu1 %v2684_v0  ;;  %2390 = vmatpush3.msra.mxu0 %v2767_v6 }
  0x20   :  { %2391 = vmatprep.mubr.msk.f32.mxu0 %vm2685_vm0, %v2684_v0  ;;  %2399 = vmatprep.subr.mxu0 %v2684_v0 }
  0x21   :  { %2497 = vset.pattern.permute.xlu0 %v2687_v41 }
  0xa5   :  { %v275_v13 = vpop.xlane.xlu0 %274 }
  0xec   :  { %v194_v10 = vpop.f32.mrb[0].mxu1  ;;  %v109_v32 = vpop.f32.mrb[0].mxu0 }
  0xed   :  { %v2779_v11 = vrot.slane %v194_v10, %v348_v9  ;;  %v2378_v12 = vpop.f32.mrb[1].mxu1  ;;  %v2373_v33 = vpop.f32.mrb[1].mxu0  ;;  %v110_v37 = vadd.f32 %v109_v32, %v35_v36 }
  0xef   :  { %v350_v15 = vadd.f32 %v2779_v11, %v275_v13  ;;  %v2274_v38 = vmul.f32 -1.442695, %v110_v37 }
  0xf0   :  { %v342_v14 = vpop.f32.mrb[2].mxu1  ;;  %v2787_v34 = vpop.f32.mrb[2].mxu0 }
  0xf1   :  { %v351_v16 = vmul.f32 2.0, %v342_v14  ;;  %v2388_v17 = vpop.f32.mrb[3].mxu1  ;;  %v2383_v35 = vpop.f32.mrb[3].mxu0 }
  0xf3   :  { %v352_v18 = vsub.f32 %v350_v15, %v351_v16 }
  0xf5   :  { %v353_v19 = vmax.f32 %v352_v18, 0.0 }
  0xf7   :  { %2499 = vrsqrt.f32 %v353_v19  ;;  %vm356_vm4 = vcmp.eq.f32.partialorder %v353_v19, inf  ;;  %v359_v22 = vand.u32 2147483648, %v353_v19  ;;  %vm358_vm5 = vcmp.eq.f32.partialorder %v353_v19, 0.0 }
 0x101   :  { %v2500_v20 = vpop.eup %2499 }
 0x102   :  { %v355_v21 = vmul.f32 %v2500_v20, %v353_v19 }
 0x104   :  { %v357_v23 = vsel %vm356_vm4, %v353_v19, %v355_v21 }
 0x105   :  { %v360_v24 = vsel %vm358_vm5, %v359_v22, %v357_v23 }
 0x106   :  { %v362_v25 = vrot.slane %v360_v24, 7 }
 0x108   :  { %v364_v26 = vsub.f32 %v360_v24, %v362_v25 }
 0x10a   :  { %v2280_v27 = vmul.f32 -1.442695, %v364_v26 }
 0x10c   :  { %2501 = vpow2.f32 %v2280_v27 }
 0x116   :  { %v2502_v28 = vpop.eup %2501 }
 0x117   :  { %v368_v29 = vadd.f32 1.0, %v2502_v28 }
 0x119   :  { %2503 = vrcp.f32 %v368_v29 }
 0x11a   :  { %2505 = vpow2.f32 %v2274_v38 }
 0x123   :  { %v2504_v30 = vpop.eup %2503 }
 0x124   :  { %v372_v31 = vrot.slane %v2504_v30, 1  ;;  %v2506_v39 = vpop.eup %2505 }
 0x125   :  { %v116_v40 = vadd.f32 1.0, %v2506_v39 }
 0x126   :  { %2392 = vmatmul.mubr.msk.f32.vlgmr.msra.gmra.mrb[4].mxu0 %vm199_vm3, %v372_v31 }
 0x127   :  { %2400 = vmatpush3.msra.mxu0 %v2767_v6  ;;  %2401 = vmatprep.mubr.msk.f32.mxu0 %vm2685_vm0, %v2684_v0  ;;  %2507 = vrcp.f32 %v116_v40 }
 0x128   :  { %2409 = vmatprep.subr.mxu0 %v2684_v0 }
 0x131   :  { %v2508_v42 = vpop.eup %2507 }
 0x132   :  { %120 = vst.msk [vmem:[#allocation6] sm:$0x1] %vm119_vm6, %v2508_v42 }
 0x1f9   :  { %v441_v43 = vpop.f32.mrb[4].mxu0 }
 0x1fa   :  { %v445_v44 = vsub.f32 %v2787_v34, %v441_v43  ;;  %v2393_v45 = vpop.f32.mrb[5].mxu0 }
 0x1fc   :  { %v447_v46 = vrot.slane %v445_v44, 7 }
 0x1fe   :  { %v450_v47 = vsel %vm449_vm7, %v441_v43, %v447_v46 }
 0x1ff   :  { %v451_v48 = vadd.f32 1e-06, %v450_v47 }
 0x201   :  { %2509 = vrcp.f32 %v451_v48 }
 0x20b   :  { %v2510_v49 = vpop.eup %2509 }
 0x20c   :  { %455 = vperm.xlu0 %2497, %v2510_v49  }
 0x28b   :  { %v456_v50 = vpop.permute.xlu0 %455 }
 0x28c   :  { %v458_v51 = vmul.f32 %v456_v50, %v450_v47 }
 0x28e   :  { %2397 = vmatmul.mubr.msk.f32.vlgmr.msra.gmra.mrb[4].mxu1 %vm36_vm1, %v458_v51  ;;  %v459_v52 = vmul.f32 %v458_v51, %v458_v51 }
 0x28f   :  { %2405 = vmatpush3.xpose.msk.msra.mxu1 %vm36_vm1, %v2739_v1  ;;  %2406 = vmatprep.mubr.msk.f32.mxu1 %vm2685_vm0, %v2684_v0 }
 0x290   :  { %v460_v53 = vsel %vm272_vm2, %v459_v52, 0.0  ;;  %2414 = vmatprep.subr.mxu1 %v2684_v0 }
 0x291   :  { %461 = vadd.xlane.f32.xlu1 %v460_v53 }
 0x31e   :  { %v462_v54 = vpop.xlane.xlu1 %461 }
 0x31f   :  { %v536_v56 = vadd.f32 %v462_v54, %v2779_v11 }
 0x361   :  { %v532_v55 = vpop.f32.mrb[4].mxu1 }
 0x362   :  { %v537_v57 = vmul.f32 2.0, %v532_v55  ;;  %v2398_v58 = vpop.f32.mrb[5].mxu1 }
 0x364   :  { %v538_v59 = vsub.f32 %v536_v56, %v537_v57 }
 0x366   :  { %v539_v60 = vmax.f32 %v538_v59, 0.0 }
 0x368   :  { %2511 = vrsqrt.f32 %v539_v60  ;;  %vm542_vm8 = vcmp.eq.f32.partialorder %v539_v60, inf  ;;  %v545_v63 = vand.u32 2147483648, %v539_v60  ;;  %vm544_vm9 = vcmp.eq.f32.partialorder %v539_v60, 0.0 }
 0x372   :  { %v2512_v61 = vpop.eup %2511 }
 0x373   :  { %v541_v62 = vmul.f32 %v2512_v61, %v539_v60 }
 0x375   :  { %v543_v2 = vsel %vm542_vm8, %v539_v60, %v541_v62 }
 0x376   :  { %v546_v3 = vsel %vm544_vm9, %v545_v63, %v543_v2 }
 0x377   :  { %v548_v4 = vrot.slane %v546_v3, 7 }
 0x379   :  { %v550_v5 = vsub.f32 %v546_v3, %v548_v4 }
 0x37b   :  { %v2284_v7 = vmul.f32 -1.442695, %v550_v5 }
 0x37d   :  { %2513 = vpow2.f32 %v2284_v7 }
 0x387   :  { %v2514_v8 = vpop.eup %2513 }
 0x388   :  { %v554_v9 = vadd.f32 1.0, %v2514_v8 }
 0x38a   :  { %2515 = vrcp.f32 %v554_v9 }
 0x394   :  { %v2516_v10 = vpop.eup %2515 }
 0x395   :  { %v558_v12 = vrot.slane %v2516_v10, 1 }
 0x397   :  { %2402 = vmatmul.mubr.msk.f32.vlgmr.msra.gmra.mrb[6].mxu0 %vm199_vm3, %v558_v12 }
 0x398   :  { %2410 = vmatpush3.msra.mxu0 %v2767_v6  ;;  %2411 = vmatprep.mubr.msk.f32.mxu0 %vm2685_vm0, %v2684_v0 }
 0x399   :  { %2419 = vmatprep.subr.mxu0 %v2684_v0 }
 0x46a   :  { %v627_v13 = vpop.f32.mrb[6].mxu0 }
 0x46b   :  { %v631_v14 = vsub.f32 %v2787_v34, %v627_v13  ;;  %v2403_v15 = vpop.f32.mrb[7].mxu0 }
 0x46d   :  { %v633_v16 = vrot.slane %v631_v14, 7 }
 0x46f   :  { %v635_v17 = vsel %vm449_vm7, %v627_v13, %v633_v16 }
 0x470   :  { %v636_v18 = vadd.f32 1e-06, %v635_v17 }
 0x472   :  { %2517 = vrcp.f32 %v636_v18 }
 0x47c   :  { %v2518_v19 = vpop.eup %2517 }
 0x47d   :  { %640 = vperm.xlu1 %2498, %v2518_v19  }
 0x4fc   :  { %v641_v20 = vpop.permute.xlu1 %640 }
 0x4fd   :  { %v643_v21 = vmul.f32 %v641_v20, %v635_v17 }
 0x4ff   :  { %2407 = vmatmul.mubr.msk.f32.vlgmr.msra.gmra.mrb[6].mxu1 %vm36_vm1, %v643_v21  ;;  %v644_v22 = vmul.f32 %v643_v21, %v643_v21 }
 0x500   :  { %2415 = vmatpush3.xpose.msk.msra.mxu1 %vm36_vm1, %v2739_v1  ;;  %2416 = vmatprep.mubr.msk.f32.mxu1 %vm2685_vm0, %v2684_v0 }
 0x501   :  { %v645_v23 = vsel %vm272_vm2, %v644_v22, 0.0  ;;  %2424 = vmatprep.subr.mxu1 %v2684_v0 }
 0x502   :  { %646 = vadd.xlane.f32.xlu1 %v645_v23 }
 0x58f   :  { %v647_v24 = vpop.xlane.xlu1 %646 }
 0x590   :  { %v721_v26 = vadd.f32 %v647_v24, %v2779_v11 }
 0x5d2   :  { %v717_v25 = vpop.f32.mrb[6].mxu1 }
 0x5d3   :  { %v722_v27 = vmul.f32 2.0, %v717_v25  ;;  %v2408_v28 = vpop.f32.mrb[7].mxu1 }
 0x5d5   :  { %v723_v29 = vsub.f32 %v721_v26, %v722_v27 }
 0x5d7   :  { %v724_v30 = vmax.f32 %v723_v29, 0.0 }
 0x5d9   :  { %2519 = vrsqrt.f32 %v724_v30  ;;  %vm727_vm10 = vcmp.eq.f32.partialorder %v724_v30, inf  ;;  %v730_v33 = vand.u32 2147483648, %v724_v30  ;;  %vm729_vm11 = vcmp.eq.f32.partialorder %v724_v30, 0.0 }
 0x5e3   :  { %v2520_v31 = vpop.eup %2519 }
 0x5e4   :  { %v726_v32 = vmul.f32 %v2520_v31, %v724_v30 }
 0x5e6   :  { %v728_v35 = vsel %vm727_vm10, %v724_v30, %v726_v32 }
 0x5e7   :  { %v731_v36 = vsel %vm729_vm11, %v730_v33, %v728_v35 }
 0x5e8   :  { %v733_v37 = vrot.slane %v731_v36, 7 }
 0x5ea   :  { %v735_v38 = vsub.f32 %v731_v36, %v733_v37 }
 0x5ec   :  { %v2288_v39 = vmul.f32 -1.442695, %v735_v38 }
 0x5ee   :  { %2521 = vpow2.f32 %v2288_v39 }
 0x5f8   :  { %v2522_v40 = vpop.eup %2521 }
 0x5f9   :  { %v739_v41 = vadd.f32 1.0, %v2522_v40 }
 0x5fb   :  { %2523 = vrcp.f32 %v739_v41 }
 0x605   :  { %v2524_v42 = vpop.eup %2523 }
 0x606   :  { %v743_v43 = vrot.slane %v2524_v42, 1 }
 0x608   :  { %2412 = vmatmul.mubr.msk.f32.vlgmr.msra.gmra.mrb[8].mxu0 %vm199_vm3, %v743_v43 }
 0x609   :  { %2420 = vmatpush3.msra.mxu0 %v2767_v6  ;;  %2421 = vmatprep.mubr.msk.f32.mxu0 %vm2685_vm0, %v2684_v0 }
 0x60a   :  { %2429 = vmatprep.subr.mxu0 %v2684_v0 }
 0x6db   :  { %v812_v44 = vpop.f32.mrb[8].mxu0 }
 0x6dc   :  { %v816_v45 = vsub.f32 %v2787_v34, %v812_v44  ;;  %v2413_v46 = vpop.f32.mrb[9].mxu0 }
 0x6de   :  { %v818_v47 = vrot.slane %v816_v45, 7 }
 0x6e0   :  { %v820_v48 = vsel %vm449_vm7, %v812_v44, %v818_v47 }
 0x6e1   :  { %v821_v49 = vadd.f32 1e-06, %v820_v48 }
 0x6e3   :  { %2525 = vrcp.f32 %v821_v49 }
 0x6ed   :  { %v2526_v50 = vpop.eup %2525 }
 0x6ee   :  { %825 = vperm.xlu0 %2497, %v2526_v50  }
 0x76d   :  { %v826_v51 = vpop.permute.xlu0 %825 }
 0x76e   :  { %v828_v52 = vmul.f32 %v826_v51, %v820_v48 }
 0x770   :  { %2417 = vmatmul.mubr.msk.f32.vlgmr.msra.gmra.mrb[8].mxu1 %vm36_vm1, %v828_v52  ;;  %v829_v53 = vmul.f32 %v828_v52, %v828_v52 }
 0x771   :  { %2425 = vmatpush3.xpose.msk.msra.mxu1 %vm36_vm1, %v2739_v1  ;;  %2426 = vmatprep.mubr.msk.f32.mxu1 %vm2685_vm0, %v2684_v0 }
 0x772   :  { %v830_v54 = vsel %vm272_vm2, %v829_v53, 0.0  ;;  %2434 = vmatprep.subr.mxu1 %v2684_v0 }
 0x773   :  { %831 = vadd.xlane.f32.xlu0 %v830_v54 }
 0x800   :  { %v832_v55 = vpop.xlane.xlu0 %831 }
 0x801   :  { %v906_v57 = vadd.f32 %v832_v55, %v2779_v11 }
 0x843   :  { %v902_v56 = vpop.f32.mrb[8].mxu1 }
 0x844   :  { %v907_v58 = vmul.f32 2.0, %v902_v56  ;;  %v2418_v59 = vpop.f32.mrb[9].mxu1 }
 0x846   :  { %v908_v60 = vsub.f32 %v906_v57, %v907_v58 }
 0x848   :  { %v909_v61 = vmax.f32 %v908_v60, 0.0 }
 0x84a   :  { %2527 = vrsqrt.f32 %v909_v61  ;;  %vm912_vm12 = vcmp.eq.f32.partialorder %v909_v61, inf  ;;  %v915_v2 = vand.u32 2147483648, %v909_v61  ;;  %vm914_vm13 = vcmp.eq.f32.partialorder %v909_v61, 0.0 }
 0x854   :  { %v2528_v62 = vpop.eup %2527 }
 0x855   :  { %v911_v63 = vmul.f32 %v2528_v62, %v909_v61 }
 0x857   :  { %v913_v3 = vsel %vm912_vm12, %v909_v61, %v911_v63 }
 0x858   :  { %v916_v4 = vsel %vm914_vm13, %v915_v2, %v913_v3 }
 0x859   :  { %v918_v5 = vrot.slane %v916_v4, 7 }
 0x85b   :  { %v920_v7 = vsub.f32 %v916_v4, %v918_v5 }
 0x85d   :  { %v2292_v8 = vmul.f32 -1.442695, %v920_v7 }
 0x85f   :  { %2529 = vpow2.f32 %v2292_v8 }
 0x869   :  { %v2530_v9 = vpop.eup %2529 }
 0x86a   :  { %v924_v10 = vadd.f32 1.0, %v2530_v9 }
 0x86c   :  { %2531 = vrcp.f32 %v924_v10 }
 0x876   :  { %v2532_v12 = vpop.eup %2531 }
 0x877   :  { %v928_v13 = vrot.slane %v2532_v12, 1 }
 0x879   :  { %2422 = vmatmul.mubr.msk.f32.vlgmr.msra.gmra.mrb[10].mxu0 %vm199_vm3, %v928_v13 }
 0x87a   :  { %2430 = vmatpush3.msra.mxu0 %v2767_v6  ;;  %2431 = vmatprep.mubr.msk.f32.mxu0 %vm2685_vm0, %v2684_v0 }
 0x87b   :  { %2439 = vmatprep.subr.mxu0 %v2684_v0 }
 0x94c   :  { %v997_v14 = vpop.f32.mrb[10].mxu0 }
 0x94d   :  { %v1001_v15 = vsub.f32 %v2787_v34, %v997_v14  ;;  %v2423_v16 = vpop.f32.mrb[11].mxu0 }
 0x94f   :  { %v1003_v17 = vrot.slane %v1001_v15, 7 }
 0x951   :  { %v1005_v18 = vsel %vm449_vm7, %v997_v14, %v1003_v17 }
 0x952   :  { %v1006_v19 = vadd.f32 1e-06, %v1005_v18 }
 0x954   :  { %2533 = vrcp.f32 %v1006_v19 }
 0x95e   :  { %v2534_v20 = vpop.eup %2533 }
 0x95f   :  { %1010 = vperm.xlu1 %2498, %v2534_v20  }
 0x9de   :  { %v1011_v21 = vpop.permute.xlu1 %1010 }
 0x9df   :  { %v1013_v22 = vmul.f32 %v1011_v21, %v1005_v18 }
 0x9e1   :  { %2427 = vmatmul.mubr.msk.f32.vlgmr.msra.gmra.mrb[10].mxu1 %vm36_vm1, %v1013_v22  ;;  %v1014_v23 = vmul.f32 %v1013_v22, %v1013_v22 }
 0x9e2   :  { %2435 = vmatpush3.xpose.msk.msra.mxu1 %vm36_vm1, %v2739_v1  ;;  %2436 = vmatprep.mubr.msk.f32.mxu1 %vm2685_vm0, %v2684_v0 }
 0x9e3   :  { %v1015_v24 = vsel %vm272_vm2, %v1014_v23, 0.0  ;;  %2444 = vmatprep.subr.mxu1 %v2684_v0 }
 0x9e4   :  { %1016 = vadd.xlane.f32.xlu1 %v1015_v24 }
 0xa71   :  { %v1017_v25 = vpop.xlane.xlu1 %1016 }
 0xa72   :  { %v1091_v27 = vadd.f32 %v1017_v25, %v2779_v11 }
 0xab4   :  { %v1087_v26 = vpop.f32.mrb[10].mxu1 }
 0xab5   :  { %v1092_v28 = vmul.f32 2.0, %v1087_v26  ;;  %v2428_v29 = vpop.f32.mrb[11].mxu1 }
 0xab7   :  { %v1093_v30 = vsub.f32 %v1091_v27, %v1092_v28 }
 0xab9   :  { %v1094_v31 = vmax.f32 %v1093_v30, 0.0 }
 0xabb   :  { %2535 = vrsqrt.f32 %v1094_v31  ;;  %vm1097_vm14 = vcmp.eq.f32.partialorder %v1094_v31, inf  ;;  %v1100_v35 = vand.u32 2147483648, %v1094_v31  ;;  %vm1099_vm15 = vcmp.eq.f32.partialorder %v1094_v31, 0.0 }
 0xac5   :  { %v2536_v32 = vpop.eup %2535 }
 0xac6   :  { %v1096_v33 = vmul.f32 %v2536_v32, %v1094_v31 }
 0xac8   :  { %v1098_v36 = vsel %vm1097_vm14, %v1094_v31, %v1096_v33 }
 0xac9   :  { %v1101_v37 = vsel %vm1099_vm15, %v1100_v35, %v1098_v36 }
 0xaca   :  { %v1103_v38 = vrot.slane %v1101_v37, 7 }
 0xacc   :  { %v1105_v39 = vsub.f32 %v1101_v37, %v1103_v38 }
 0xace   :  { %v2296_v40 = vmul.f32 -1.442695, %v1105_v39 }
 0xad0   :  { %2537 = vpow2.f32 %v2296_v40 }
 0xada   :  { %v2538_v41 = vpop.eup %2537 }
 0xadb   :  { %v1109_v42 = vadd.f32 1.0, %v2538_v41 }
 0xadd   :  { %2539 = vrcp.f32 %v1109_v42 }
 0xae7   :  { %v2540_v43 = vpop.eup %2539 }
 0xae8   :  { %v1113_v44 = vrot.slane %v2540_v43, 1 }
 0xaea   :  { %2432 = vmatmul.mubr.msk.f32.vlgmr.msra.gmra.mrb[12].mxu0 %vm199_vm3, %v1113_v44 }
 0xaeb   :  { %2440 = vmatpush3.msra.mxu0 %v2767_v6  ;;  %2441 = vmatprep.mubr.msk.f32.mxu0 %vm2685_vm0, %v2684_v0 }
 0xaec   :  { %2449 = vmatprep.subr.mxu0 %v2684_v0 }
 0xbbd   :  { %v1182_v45 = vpop.f32.mrb[12].mxu0 }
 0xbbe   :  { %v1186_v46 = vsub.f32 %v2787_v34, %v1182_v45  ;;  %v2433_v47 = vpop.f32.mrb[13].mxu0 }
 0xbc0   :  { %v1188_v48 = vrot.slane %v1186_v46, 7 }
 0xbc2   :  { %v1190_v49 = vsel %vm449_vm7, %v1182_v45, %v1188_v48 }
 0xbc3   :  { %v1191_v50 = vadd.f32 1e-06, %v1190_v49 }
 0xbc5   :  { %2541 = vrcp.f32 %v1191_v50 }
 0xbcf   :  { %v2542_v51 = vpop.eup %2541 }
 0xbd0   :  { %1195 = vperm.xlu0 %2497, %v2542_v51  }
 0xc4f   :  { %v1196_v52 = vpop.permute.xlu0 %1195 }
 0xc50   :  { %v1198_v53 = vmul.f32 %v1196_v52, %v1190_v49 }
 0xc52   :  { %2437 = vmatmul.mubr.msk.f32.vlgmr.msra.gmra.mrb[12].mxu1 %vm36_vm1, %v1198_v53  ;;  %v1199_v54 = vmul.f32 %v1198_v53, %v1198_v53 }
 0xc53   :  { %2445 = vmatpush3.xpose.msk.msra.mxu1 %vm36_vm1, %v2739_v1  ;;  %2446 = vmatprep.mubr.msk.f32.mxu1 %vm2685_vm0, %v2684_v0 }
 0xc54   :  { %v1200_v55 = vsel %vm272_vm2, %v1199_v54, 0.0  ;;  %2454 = vmatprep.subr.mxu1 %v2684_v0 }
 0xc55   :  { %1201 = vadd.xlane.f32.xlu0 %v1200_v55 }
 0xce2   :  { %v1202_v56 = vpop.xlane.xlu0 %1201 }
 0xce3   :  { %v1276_v58 = vadd.f32 %v1202_v56, %v2779_v11 }
 0xd25   :  { %v1272_v57 = vpop.f32.mrb[12].mxu1 }
 0xd26   :  { %v1277_v59 = vmul.f32 2.0, %v1272_v57  ;;  %v2438_v60 = vpop.f32.mrb[13].mxu1 }
 0xd28   :  { %v1278_v61 = vsub.f32 %v1276_v58, %v1277_v59 }
 0xd2a   :  { %v1279_v62 = vmax.f32 %v1278_v61, 0.0 }
 0xd2c   :  { %2543 = vrsqrt.f32 %v1279_v62  ;;  %vm1282_vm4 = vcmp.eq.f32.partialorder %v1279_v62, inf  ;;  %v1285_v3 = vand.u32 2147483648, %v1279_v62  ;;  %vm1284_vm5 = vcmp.eq.f32.partialorder %v1279_v62, 0.0 }
 0xd36   :  { %v2544_v63 = vpop.eup %2543 }
 0xd37   :  { %v1281_v2 = vmul.f32 %v2544_v63, %v1279_v62 }
 0xd39   :  { %v1283_v4 = vsel %vm1282_vm4, %v1279_v62, %v1281_v2 }
 0xd3a   :  { %v1286_v5 = vsel %vm1284_vm5, %v1285_v3, %v1283_v4 }
 0xd3b   :  { %v1288_v7 = vrot.slane %v1286_v5, 7 }
 0xd3d   :  { %v1290_v8 = vsub.f32 %v1286_v5, %v1288_v7 }
 0xd3f   :  { %v2300_v9 = vmul.f32 -1.442695, %v1290_v8 }
 0xd41   :  { %2545 = vpow2.f32 %v2300_v9 }
 0xd4b   :  { %v2546_v10 = vpop.eup %2545 }
 0xd4c   :  { %v1294_v12 = vadd.f32 1.0, %v2546_v10 }
 0xd4e   :  { %2547 = vrcp.f32 %v1294_v12 }
 0xd58   :  { %v2548_v13 = vpop.eup %2547 }
 0xd59   :  { %v1298_v14 = vrot.slane %v2548_v13, 1 }
 0xd5b   :  { %2442 = vmatmul.mubr.msk.f32.vlgmr.msra.gmra.mrb[14].mxu0 %vm199_vm3, %v1298_v14 }
 0xd5c   :  { %2450 = vmatpush3.msra.mxu0 %v2767_v6  ;;  %2451 = vmatprep.mubr.msk.f32.mxu0 %vm2685_vm0, %v2684_v0 }
 0xd5d   :  { %2459 = vmatprep.subr.mxu0 %v2684_v0 }
 0xe2e   :  { %v1367_v15 = vpop.f32.mrb[14].mxu0 }
 0xe2f   :  { %v1371_v16 = vsub.f32 %v2787_v34, %v1367_v15  ;;  %v2443_v17 = vpop.f32.mrb[15].mxu0 }
 0xe31   :  { %v1373_v18 = vrot.slane %v1371_v16, 7 }
 0xe33   :  { %v1375_v19 = vsel %vm449_vm7, %v1367_v15, %v1373_v18 }
 0xe34   :  { %v1376_v20 = vadd.f32 1e-06, %v1375_v19 }
 0xe36   :  { %2549 = vrcp.f32 %v1376_v20 }
 0xe40   :  { %v2550_v21 = vpop.eup %2549 }
 0xe41   :  { %1380 = vperm.xlu1 %2498, %v2550_v21  }
 0xec0   :  { %v1381_v22 = vpop.permute.xlu1 %1380 }
 0xec1   :  { %v1383_v23 = vmul.f32 %v1381_v22, %v1375_v19 }
 0xec3   :  { %2447 = vmatmul.mubr.msk.f32.vlgmr.msra.gmra.mrb[14].mxu1 %vm36_vm1, %v1383_v23  ;;  %v1384_v24 = vmul.f32 %v1383_v23, %v1383_v23 }
 0xec4   :  { %2455 = vmatpush3.xpose.msk.msra.mxu1 %vm36_vm1, %v2739_v1  ;;  %2456 = vmatprep.mubr.msk.f32.mxu1 %vm2685_vm0, %v2684_v0 }
 0xec5   :  { %v1385_v25 = vsel %vm272_vm2, %v1384_v24, 0.0  ;;  %2464 = vmatprep.subr.mxu1 %v2684_v0 }
 0xec6   :  { %1386 = vadd.xlane.f32.xlu1 %v1385_v25 }
 0xf53   :  { %v1387_v26 = vpop.xlane.xlu1 %1386 }
 0xf54   :  { %v1461_v28 = vadd.f32 %v1387_v26, %v2779_v11 }
 0xf96   :  { %v1457_v27 = vpop.f32.mrb[14].mxu1 }
 0xf97   :  { %v1462_v29 = vmul.f32 2.0, %v1457_v27  ;;  %v2448_v30 = vpop.f32.mrb[15].mxu1 }
 0xf99   :  { %v1463_v31 = vsub.f32 %v1461_v28, %v1462_v29 }
 0xf9b   :  { %v1464_v32 = vmax.f32 %v1463_v31, 0.0 }
 0xf9d   :  { %2551 = vrsqrt.f32 %v1464_v32  ;;  %vm1467_vm6 = vcmp.eq.f32.partialorder %v1464_v32, inf  ;;  %v1470_v36 = vand.u32 2147483648, %v1464_v32  ;;  %vm1469_vm8 = vcmp.eq.f32.partialorder %v1464_v32, 0.0 }
 0xfa7   :  { %v2552_v33 = vpop.eup %2551 }
 0xfa8   :  { %v1466_v35 = vmul.f32 %v2552_v33, %v1464_v32 }
 0xfaa   :  { %v1468_v37 = vsel %vm1467_vm6, %v1464_v32, %v1466_v35 }
 0xfab   :  { %v1471_v38 = vsel %vm1469_vm8, %v1470_v36, %v1468_v37 }
 0xfac   :  { %v1473_v39 = vrot.slane %v1471_v38, 7 }
 0xfae   :  { %v1475_v40 = vsub.f32 %v1471_v38, %v1473_v39 }
 0xfb0   :  { %v2304_v41 = vmul.f32 -1.442695, %v1475_v40 }
 0xfb2   :  { %2553 = vpow2.f32 %v2304_v41 }
 0xfbc   :  { %v2554_v42 = vpop.eup %2553 }
 0xfbd   :  { %v1479_v43 = vadd.f32 1.0, %v2554_v42 }
 0xfbf   :  { %2555 = vrcp.f32 %v1479_v43 }
 0xfc9   :  { %v2556_v44 = vpop.eup %2555 }
 0xfca   :  { %v1483_v45 = vrot.slane %v2556_v44, 1 }
 0xfcc   :  { %2452 = vmatmul.mubr.msk.f32.vlgmr.msra.gmra.mrb[16].mxu0 %vm199_vm3, %v1483_v45 }
 0xfcd   :  { %2460 = vmatpush3.msra.mxu0 %v2767_v6  ;;  %2461 = vmatprep.mubr.msk.f32.mxu0 %vm2685_vm0, %v2684_v0 }
 0xfce   :  { %2469 = vmatprep.subr.mxu0 %v2684_v0 }
0x109f   :  { %v1552_v46 = vpop.f32.mrb[16].mxu0 }
0x10a0   :  { %v1556_v47 = vsub.f32 %v2787_v34, %v1552_v46  ;;  %v2453_v48 = vpop.f32.mrb[17].mxu0 }
0x10a2   :  { %v1558_v49 = vrot.slane %v1556_v47, 7 }
0x10a4   :  { %v1560_v50 = vsel %vm449_vm7, %v1552_v46, %v1558_v49 }
0x10a5   :  { %v1561_v51 = vadd.f32 1e-06, %v1560_v50 }
0x10a7   :  { %2557 = vrcp.f32 %v1561_v51 }
0x10b1   :  { %v2558_v52 = vpop.eup %2557 }
0x10b2   :  { %1565 = vperm.xlu0 %2497, %v2558_v52  }
0x1131   :  { %v1566_v53 = vpop.permute.xlu0 %1565 }
0x1132   :  { %v1568_v54 = vmul.f32 %v1566_v53, %v1560_v50 }
0x1134   :  { %2457 = vmatmul.mubr.msk.f32.vlgmr.msra.gmra.mrb[16].mxu1 %vm36_vm1, %v1568_v54  ;;  %v1569_v55 = vmul.f32 %v1568_v54, %v1568_v54 }
0x1135   :  { %2465 = vmatpush3.xpose.msk.msra.mxu1 %vm36_vm1, %v2739_v1  ;;  %2466 = vmatprep.mubr.msk.f32.mxu1 %vm2685_vm0, %v2684_v0 }
0x1136   :  { %v1570_v56 = vsel %vm272_vm2, %v1569_v55, 0.0  ;;  %2474 = vmatprep.subr.mxu1 %v2684_v0 }
0x1137   :  { %1571 = vadd.xlane.f32.xlu0 %v1570_v56 }
0x11c4   :  { %v1572_v57 = vpop.xlane.xlu0 %1571 }
0x11c5   :  { %v1646_v59 = vadd.f32 %v1572_v57, %v2779_v11 }
0x1207   :  { %v1642_v58 = vpop.f32.mrb[16].mxu1 }
0x1208   :  { %v1647_v60 = vmul.f32 2.0, %v1642_v58  ;;  %v2458_v61 = vpop.f32.mrb[17].mxu1 }
0x120a   :  { %v1648_v62 = vsub.f32 %v1646_v59, %v1647_v60 }
0x120c   :  { %v1649_v63 = vmax.f32 %v1648_v62, 0.0 }
0x120e   :  { %2559 = vrsqrt.f32 %v1649_v63  ;;  %vm1652_vm9 = vcmp.eq.f32.partialorder %v1649_v63, inf  ;;  %v1655_v4 = vand.u32 2147483648, %v1649_v63  ;;  %vm1654_vm10 = vcmp.eq.f32.partialorder %v1649_v63, 0.0 }
0x1218   :  { %v2560_v2 = vpop.eup %2559 }
0x1219   :  { %v1651_v3 = vmul.f32 %v2560_v2, %v1649_v63 }
0x121b   :  { %v1653_v5 = vsel %vm1652_vm9, %v1649_v63, %v1651_v3 }
0x121c   :  { %v1656_v7 = vsel %vm1654_vm10, %v1655_v4, %v1653_v5 }
0x121d   :  { %v1658_v8 = vrot.slane %v1656_v7, 7 }
0x121f   :  { %v1660_v9 = vsub.f32 %v1656_v7, %v1658_v8 }
0x1221   :  { %v2308_v10 = vmul.f32 -1.442695, %v1660_v9 }
0x1223   :  { %2561 = vpow2.f32 %v2308_v10 }
0x122d   :  { %v2562_v12 = vpop.eup %2561 }
0x122e   :  { %v1664_v13 = vadd.f32 1.0, %v2562_v12 }
0x1230   :  { %2563 = vrcp.f32 %v1664_v13 }
0x123a   :  { %v2564_v14 = vpop.eup %2563 }
0x123b   :  { %v1668_v15 = vrot.slane %v2564_v14, 1 }
0x123d   :  { %2462 = vmatmul.mubr.msk.f32.vlgmr.msra.gmra.mrb[18].mxu0 %vm199_vm3, %v1668_v15 }
0x123e   :  { %2470 = vmatpush3.msra.mxu0 %v2767_v6  ;;  %2471 = vmatprep.mubr.msk.f32.mxu0 %vm2685_vm0, %v2684_v0 }
0x123f   :  { %2479 = vmatprep.subr.mxu0 %v2684_v0 }
0x1310   :  { %v1737_v16 = vpop.f32.mrb[18].mxu0 }
0x1311   :  { %v1741_v17 = vsub.f32 %v2787_v34, %v1737_v16  ;;  %v2463_v18 = vpop.f32.mrb[19].mxu0 }
0x1313   :  { %v1743_v19 = vrot.slane %v1741_v17, 7 }
0x1315   :  { %v1745_v20 = vsel %vm449_vm7, %v1737_v16, %v1743_v19 }
0x1316   :  { %v1746_v21 = vadd.f32 1e-06, %v1745_v20 }
0x1318   :  { %2565 = vrcp.f32 %v1746_v21 }
0x1322   :  { %v2566_v22 = vpop.eup %2565 }
0x1323   :  { %1750 = vperm.xlu1 %2498, %v2566_v22  }
0x13a2   :  { %v1751_v23 = vpop.permute.xlu1 %1750 }
0x13a3   :  { %v1753_v24 = vmul.f32 %v1751_v23, %v1745_v20 }
0x13a5   :  { %2467 = vmatmul.mubr.msk.f32.vlgmr.msra.gmra.mrb[18].mxu1 %vm36_vm1, %v1753_v24  ;;  %v1754_v25 = vmul.f32 %v1753_v24, %v1753_v24 }
0x13a6   :  { %2475 = vmatpush3.xpose.msk.msra.mxu1 %vm36_vm1, %v2739_v1  ;;  %2476 = vmatprep.mubr.msk.f32.mxu1 %vm2685_vm0, %v2684_v0 }
0x13a7   :  { %v1755_v26 = vsel %vm272_vm2, %v1754_v25, 0.0  ;;  %2484 = vmatprep.subr.mxu1 %v2684_v0 }
0x13a8   :  { %1756 = vadd.xlane.f32.xlu1 %v1755_v26 }
0x1435   :  { %v1757_v27 = vpop.xlane.xlu1 %1756 }
0x1436   :  { %v1831_v29 = vadd.f32 %v1757_v27, %v2779_v11 }
0x1478   :  { %v1827_v28 = vpop.f32.mrb[18].mxu1 }
0x1479   :  { %v1832_v30 = vmul.f32 2.0, %v1827_v28  ;;  %v2468_v31 = vpop.f32.mrb[19].mxu1 }
0x147b   :  { %v1833_v32 = vsub.f32 %v1831_v29, %v1832_v30 }
0x147d   :  { %v1834_v33 = vmax.f32 %v1833_v32, 0.0 }
0x147f   :  { %2567 = vrsqrt.f32 %v1834_v33  ;;  %vm1837_vm11 = vcmp.eq.f32.partialorder %v1834_v33, inf  ;;  %v1840_v37 = vand.u32 2147483648, %v1834_v33  ;;  %vm1839_vm12 = vcmp.eq.f32.partialorder %v1834_v33, 0.0 }
0x1489   :  { %v2568_v35 = vpop.eup %2567 }
0x148a   :  { %v1836_v36 = vmul.f32 %v2568_v35, %v1834_v33 }
0x148c   :  { %v1838_v38 = vsel %vm1837_vm11, %v1834_v33, %v1836_v36 }
0x148d   :  { %v1841_v39 = vsel %vm1839_vm12, %v1840_v37, %v1838_v38 }
0x148e   :  { %v1843_v40 = vrot.slane %v1841_v39, 7 }
0x1490   :  { %v1845_v41 = vsub.f32 %v1841_v39, %v1843_v40 }
0x1492   :  { %v2312_v42 = vmul.f32 -1.442695, %v1845_v41 }
0x1494   :  { %2569 = vpow2.f32 %v2312_v42 }
0x149e   :  { %v2570_v43 = vpop.eup %2569 }
0x149f   :  { %v1849_v44 = vadd.f32 1.0, %v2570_v43 }
0x14a1   :  { %2571 = vrcp.f32 %v1849_v44 }
0x14ab   :  { %v2572_v45 = vpop.eup %2571 }
0x14ac   :  { %v1853_v46 = vrot.slane %v2572_v45, 1 }
0x14ae   :  { %2472 = vmatmul.mubr.msk.f32.vlgmr.msra.gmra.mrb[20].mxu0 %vm199_vm3, %v1853_v46 }
0x14af   :  { %2480 = vmatpush3.msra.mxu0 %v2767_v6  ;;  %2481 = vmatprep.mubr.msk.f32.mxu0 %vm2685_vm0, %v2684_v0 }
0x1581   :  { %v1922_v47 = vpop.f32.mrb[20].mxu0 }
0x1582   :  { %v1926_v48 = vsub.f32 %v2787_v34, %v1922_v47  ;;  %v2473_v49 = vpop.f32.mrb[21].mxu0 }
0x1584   :  { %v1928_v50 = vrot.slane %v1926_v48, 7 }
0x1586   :  { %v1930_v51 = vsel %vm449_vm7, %v1922_v47, %v1928_v50 }
0x1587   :  { %v1931_v52 = vadd.f32 1e-06, %v1930_v51 }
0x1589   :  { %2573 = vrcp.f32 %v1931_v52 }
0x1593   :  { %v2574_v53 = vpop.eup %2573 }
0x1594   :  { %1935 = vperm.xlu0 %2497, %v2574_v53  }
0x1613   :  { %v1936_v54 = vpop.permute.xlu0 %1935 }
0x1614   :  { %v1938_v55 = vmul.f32 %v1936_v54, %v1930_v51 }
0x1616   :  { %2477 = vmatmul.mubr.msk.f32.vlgmr.msra.gmra.mrb[20].mxu1 %vm36_vm1, %v1938_v55  ;;  %v1939_v56 = vmul.f32 %v1938_v55, %v1938_v55 }
0x1617   :  { %2485 = vmatpush3.xpose.msk.msra.mxu1 %vm36_vm1, %v2739_v1  ;;  %2486 = vmatprep.mubr.msk.f32.mxu1 %vm2685_vm0, %v2684_v0 }
0x1618   :  { %v1940_v6 = vsel %vm272_vm2, %v1939_v56, 0.0 }
0x1619   :  { %1941 = vadd.xlane.f32.xlu0 %v1940_v6 }
0x16a6   :  { %v1942_v57 = vpop.xlane.xlu0 %1941 }
0x16a7   :  { %v2016_v59 = vadd.f32 %v1942_v57, %v2779_v11 }
0x16e9   :  { %v2012_v58 = vpop.f32.mrb[20].mxu1 }
0x16ea   :  { %v2017_v60 = vmul.f32 2.0, %v2012_v58  ;;  %v2478_v61 = vpop.f32.mrb[21].mxu1 }
0x16ec   :  { %v2018_v62 = vsub.f32 %v2016_v59, %v2017_v60 }
0x16ee   :  { %v2019_v63 = vmax.f32 %v2018_v62, 0.0 }
0x16f0   :  { %2575 = vrsqrt.f32 %v2019_v63  ;;  %vm2022_vm13 = vcmp.eq.f32.partialorder %v2019_v63, inf  ;;  %v2025_v4 = vand.u32 2147483648, %v2019_v63  ;;  %vm2024_vm14 = vcmp.eq.f32.partialorder %v2019_v63, 0.0 }
0x16fa   :  { %v2576_v2 = vpop.eup %2575 }
0x16fb   :  { %v2021_v3 = vmul.f32 %v2576_v2, %v2019_v63 }
0x16fd   :  { %v2023_v1 = vsel %vm2022_vm13, %v2019_v63, %v2021_v3 }
0x16fe   :  { %v2026_v5 = vsel %vm2024_vm14, %v2025_v4, %v2023_v1 }
0x16ff   :  { %v2028_v0 = vrot.slane %v2026_v5, 7 }
0x1701   :  { %v2030_v7 = vsub.f32 %v2026_v5, %v2028_v0 }
0x1703   :  { %v2316_v8 = vmul.f32 -1.442695, %v2030_v7 }
0x1705   :  { %2577 = vpow2.f32 %v2316_v8 }
0x170f   :  { %v2578_v9 = vpop.eup %2577 }
0x1710   :  { %v2034_v10 = vadd.f32 1.0, %v2578_v9 }
0x1712   :  { %2579 = vrcp.f32 %v2034_v10 }
0x171c   :  { %v2580_v12 = vpop.eup %2579 }
0x171d   :  { %v2038_v13 = vrot.slane %v2580_v12, 1 }
0x171f   :  { %2482 = vmatmul.mubr.msk.f32.vlgmr.msra.gmra.mrb[22].mxu0 %vm199_vm3, %v2038_v13 }
0x17f2   :  { %v2107_v14 = vpop.f32.mrb[22].mxu0 }
0x17f3   :  { %v2111_v15 = vsub.f32 %v2787_v34, %v2107_v14  ;;  %v2483_v16 = vpop.f32.mrb[23].mxu0 }
0x17f5   :  { %v2113_v17 = vrot.slane %v2111_v15, 7 }
0x17f7   :  { %v2115_v18 = vsel %vm449_vm7, %v2107_v14, %v2113_v17 }
0x17f8   :  { %v2116_v19 = vadd.f32 1e-06, %v2115_v18 }
0x17fa   :  { %2581 = vrcp.f32 %v2116_v19 }
0x1804   :  { %v2582_v20 = vpop.eup %2581 }
0x1805   :  { %2120 = vperm.xlu1 %2498, %v2582_v20  }
0x1884   :  { %v2121_v21 = vpop.permute.xlu1 %2120 }
0x1885   :  { %v2123_v22 = vmul.f32 %v2121_v21, %v2115_v18 }
0x1887   :  { %2124 = vst.msk [vmem:[#allocation7] sm:$0x3] %vm272_vm2, %v2123_v22  ;;  %2487 = vmatmul.mubr.msk.f32.vlgmr.msra.gmra.mrb[22].mxu1 %vm36_vm1, %v2123_v22  ;;  %v2125_v23 = vmul.f32 %v2123_v22, %v2123_v22 }
0x1889   :  { %v2126_v24 = vsel %vm272_vm2, %v2125_v23, 0.0 }
0x188a   :  { %2127 = vadd.xlane.f32.xlu1 %v2126_v24 }
0x188b   :  { %2622 = shalt.err (!%p2619_p12)
}
0x188c   :  { %s2623_s13 = scalar_lea.hbm %s2968_s4, 32 }
0x188d   :  { %p2624_p13 = scmp.ne.s32.totalorder %s2968_s4, %s2623_s13  ;;  %p2627_p0 = scmp.lt.u32.totalorder %s2623_s13, %s2968_s4 }
0x188f   :  { %p2629_p1 = pnand %p2627_p0, %p2624_p13 }
0x1891   :  { %2632 = shalt.err (!%p2629_p1)
}
0x1892   :  { %2249 = dma.vmem_to_hbm [thread:$0]  %s2247_s7, 32, %s2968_s4, [#allocation8]  }
0x1893   :  { %s2633_s20 = scalar_lea.vmem %s2237_s9, 16  ;;  %s2637_s21 = scalar_lea.vmem %s2237_s9, 32 }
0x1894   :  { %p2634_p2 = scmp.ne.s32.totalorder %s2237_s9, %s2633_s20  ;;  %p2638_p3 = scmp.lt.s32.totalorder %s2237_s9, %s2237_s9 }
0x1895   :  { %p2639_p4 = scmp.lt.s32.totalorder %s2637_s21, %s2633_s20 }
0x1897   :  { %p2640_p5 = por %p2639_p4, %p2638_p3 }
0x1899   :  { %p2641_p6 = pnand %p2640_p5, %p2634_p2 }
0x189b   :  { %2644 = shalt.err (!%p2641_p6)
}
0x189c   :  { %s2645_s24 = scalar_lea.hbm %s2967_s3, 16 }
0x189d   :  { %p2646_p7 = scmp.ne.s32.totalorder %s2967_s3, %s2645_s24  ;;  %p2649_p8 = scmp.lt.u32.totalorder %s2645_s24, %s2967_s3 }
0x189f   :  { %p2651_p9 = pnand %p2649_p8, %p2646_p7 }
0x18a1   :  { %2654 = shalt.err (!%p2651_p9)
}
0x18a2   :  { %2239 = dma.vmem_to_hbm [thread:$0]  %s2237_s9, 16, %s2967_s3, [#allocation5]   ;;  %vm2228_vm2 = vcmask 58368  }
0x18a3   :  { %s2690_s3 = smov [#allocation9]  }
0x18a4   :  { %s2256_s0 = sshll.u32 %s2690_s3, 4  ;;  %s2257_s0 = int_to_ptr.vmem [resolvable:$true] %s2256_s0 }
0x18a5   :  { %s2655_s30 = scalar_lea.vmem %s2257_s0, 32  ;;  %p2660_p11 = scmp.lt.s32.totalorder %s2257_s0, %s2257_s0 }
0x18a6   :  { %p2656_p10 = scmp.ne.s32.totalorder %s2257_s0, %s2655_s30  ;;  %p2661_p12 = scmp.lt.s32.totalorder %s2655_s30, %s2655_s30 }
0x18a8   :  { %p2662_p13 = por %p2661_p12, %p2660_p11 }
0x18aa   :  { %p2663_p0 = pnand %p2662_p13, %p2656_p10 }
0x1917   :  { %v2128_v34 = vpop.xlane.xlu1 %2127 }
0x1918   :  { %v2202_v26 = vadd.f32 %v2128_v34, %v2779_v11 }
0x195a   :  { %v2198_v25 = vpop.f32.mrb[22].mxu1 }
0x195b   :  { %v2203_v27 = vmul.f32 2.0, %v2198_v25  ;;  %v2488_v28 = vpop.f32.mrb[23].mxu1 }
0x195d   :  { %v2204_v29 = vsub.f32 %v2202_v26, %v2203_v27 }
0x195f   :  { %v2205_v30 = vmax.f32 %v2204_v29, 0.0 }
0x1961   :  { %2583 = vrsqrt.f32 %v2205_v30  ;;  %vm2208_vm0 = vcmp.eq.f32.partialorder %v2205_v30, inf  ;;  %v2211_v33 = vand.u32 2147483648, %v2205_v30  ;;  %vm2210_vm1 = vcmp.eq.f32.partialorder %v2205_v30, 0.0 }
0x196b   :  { %v2584_v31 = vpop.eup %2583 }
0x196c   :  { %v2207_v32 = vmul.f32 %v2584_v31, %v2205_v30 }
0x196e   :  { %v2209_v35 = vsel %vm2208_vm0, %v2205_v30, %v2207_v32 }
0x196f   :  { %v2212_v36 = vsel %vm2210_vm1, %v2211_v33, %v2209_v35 }
0x1970   :  { %v2214_v37 = vrot.slane %v2212_v36, 7 }
0x1972   :  { %v2216_v38 = vsub.f32 %v2212_v36, %v2214_v37 }
0x1974   :  { %v2320_v39 = vmul.f32 -1.442695, %v2216_v38 }
0x1976   :  { %2585 = vpow2.f32 %v2320_v39 }
0x1980   :  { %v2586_v40 = vpop.eup %2585 }
0x1981   :  { %v2220_v41 = vadd.f32 1.0, %v2586_v40 }
0x1983   :  { %2587 = vrcp.f32 %v2220_v41 }
0x198d   :  { %v2588_v11 = vpop.eup %2587 }
0x198e   :  { %v2223_v42 = vsub.f32 1.0, %v2588_v11  ;;  %v2225_v43 = vrot.slane %v2588_v11, 1 }
0x1990   :  { %v2227_v44 = vsel %vm449_vm7, %v2225_v43, %v2223_v42 }
0x1991   :  { %2229 = vst.msk [vmem:[#allocation9] sm:$0x3] %vm2228_vm2, %v2227_v44 }
0x1992   :  { %2666 = shalt.err (!%p2663_p0)
}
0x1993   :  { %s2667_s2 = scalar_lea.hbm %s2969_s5, 32 }
0x1994   :  { %p2668_p1 = scmp.ne.s32.totalorder %s2969_s5, %s2667_s2  ;;  %p2671_p2 = scmp.lt.u32.totalorder %s2667_s2, %s2969_s5 }
0x1996   :  { %p2673_p3 = pnand %p2671_p2, %p2668_p1 }
0x1998   :  { %2676 = shalt.err (!%p2673_p3)
}
0x1999   :  { %2259 = dma.vmem_to_hbm [thread:$0]  %s2257_s0, 32, %s2969_s5, [#allocation8]  }
0x199a   :  { %2679 = dma.done.wait [#allocation5], 16  }
0x199b   :  { %2680 = vsyncadd [#allocation5], 4294967280 }
0x199c   :  { %2681 = dma.done.wait [#allocation8], 64  }
0x199d   :  { %2682 = vsyncadd [#allocation8], 4294967232 }
0x199e   :  { %2269 = vsyncpa [#allocation4], 1 }
0x199f   :  { %2270 = vsyncpa [#allocation5], 1 }
0x19a0   :  { %2271 = vsyncpa [#allocation8], 1 }

</bundles_post_ra>
